<compile_context>
chip_gen: v7x
topology: tpu7x:2x2x1
jax: 0.10.0
libtpu: 0.0.40
codegen_flags: <defaults>
</compile_context>

<pallas_src>
import functools
import math

import jax
import jax.numpy as jnp
from jax import lax
from jax.experimental import pallas as pl
from jax.experimental.pallas import tpu as pltpu


# ----------------------------- in-kernel helpers -----------------------------

def _erf_approx(x):
    # Abramowitz & Stegun 7.1.26 (f32-accurate rational approximation).
    p = 0.3275911
    a1, a2, a3, a4, a5 = 0.254829592, -0.284496736, 1.421413741, -1.453152027, 1.061405429
    sign = jnp.where(x >= 0.0, 1.0, -1.0)
    ax = jnp.abs(x)
    t = 1.0 / (1.0 + p * ax)
    poly = ((((a5 * t + a4) * t + a3) * t + a2) * t + a1) * t
    return sign * (1.0 - poly * jnp.exp(-ax * ax))


def _gelu_exact(x):
    return 0.5 * x * (1.0 + _erf_approx(x * 0.7071067811865476))


def _layernorm_cm(x, w, b, eps=1e-6):
    # x: (C, N) channel-major; normalize over channels (the sublane axis).
    mu = jnp.mean(x, axis=0, keepdims=True)
    d = x - mu
    var = jnp.mean(d * d, axis=0, keepdims=True)
    return d * lax.rsqrt(var + eps) * w + b


def _l2norm_rows(x, eps=1e-12):
    # per-row L2 normalize over the lane axis == F.normalize(dim=-1).
    n = jnp.sqrt(jnp.sum(x * x, axis=-1, keepdims=True))
    return x / jnp.maximum(n, eps)


def _bf16(x):
    return x.astype(jnp.bfloat16)


# --------------------------------- the kernel --------------------------------

def sdta_kernel(x_ref, conv_w_ref, conv_b_ref, conv_mask_ref, pos_ref,
                ln1_w_ref, ln1_b_ref,
                qkv_w_ref, qkv_b_ref, temp_ref, head_mask_ref,
                proj_w_ref, proj_b_ref, gamma_xca_ref,
                ln2_w_ref, ln2_b_ref,
                pw1_w_ref, pw1_b_ref, pw2_w_ref, pw2_b_ref, gamma_ref,
                out_ref, *, H, W):
    C = x_ref.shape[1]
    N = x_ref.shape[2]

    x_in = x_ref[0]                                  # (C, N) f32, original input

    # ---- depthwise 3x3 conv (identity-extended for pass-through channels) ----
    # out[c, h*W+w] = sum_{oy,ox in {-1,0,1}} w[c,(oy+1)*3+(ox+1)]
    #                  * x[c, (h+oy)*W + (w+ox)] * in_bounds(h+oy, w+ox)
    # Lane rolls give x[c, (n + oy*W + ox) % N]; the precomputed (9, N) mask
    # zeroes out-of-bounds taps (== zero padding). Rolls run on the XLU slot.
    cw = conv_w_ref[...]                             # (C, 9)
    cm = conv_mask_ref[...]                          # (9, N) in {0, 1}
    t = x_in * cw[:, 4:5]                            # center tap (always in bounds)
    for k in range(9):
        if k == 4:
            continue
        oy, ox = k // 3 - 1, k % 3 - 1
        off = oy * W + ox
        # rolled[:, n] = x_in[:, (n + off) % N]   (jnp.roll semantics)
        rolled = pltpu.roll(x_in, shift=(-off) % N, axis=1)
        t = t + (rolled * cm[k:k + 1, :]) * cw[:, k:k + 1]
    t = t + conv_b_ref[...] + pos_ref[...]           # + conv bias + pos. embedding

    # ---- XCA (cross-covariance attention) ------------------------------------
    xn = _layernorm_cm(t, ln1_w_ref[...], ln1_b_ref[...])
    qkv = jnp.dot(qkv_w_ref[...], _bf16(xn),
                  preferred_element_type=jnp.float32) + qkv_b_ref[...]     # (3C, N)
    q = qkv[:C]
    k_ = qkv[C:2 * C]
    v = qkv[2 * C:]
    qn = _l2norm_rows(q)
    kn = _l2norm_rows(k_)
    # Full (C, C) cross-covariance; per-head attention lives on the block
    # diagonal (channel c belongs to head c // head_dim, head-major as in torch).
    s = lax.dot_general(_bf16(qn), _bf16(kn), (((1,), (1,)), ((), ())),
                        preferred_element_type=jnp.float32)                # (C, C)
    hm = head_mask_ref[...]                                                # (C, C)
    logits = s * temp_ref[...]                                             # per-head temperature (row-wise)
    logits = logits * hm - (1.0 - hm) * 1e30                               # mask off-head entries
    logits = logits - jnp.max(logits, axis=-1, keepdims=True)
    e = jnp.exp(logits)
    attn = e / jnp.sum(e, axis=-1, keepdims=True)                          # block-diag softmax
    o = jnp.dot(_bf16(attn), _bf16(v), preferred_element_type=jnp.float32)     # (C, N)
    xca = jnp.dot(proj_w_ref[...], _bf16(o),
                  preferred_element_type=jnp.float32) + proj_b_ref[...]    # (C, N)
    t = t + gamma_xca_ref[...] * xca

    # ---- LayerNorm + pointwise MLP (pwconv1 -> GELU -> pwconv2) + layer scale -
    yn = _layernorm_cm(t, ln2_w_ref[...], ln2_b_ref[...])
    h1 = jnp.dot(pw1_w_ref[...], _bf16(yn),
                 preferred_element_type=jnp.float32) + pw1_b_ref[...]      # (4C, N)
    h1 = _gelu_exact(h1)
    h2 = jnp.dot(pw2_w_ref[...], _bf16(h1),
                 preferred_element_type=jnp.float32) + pw2_b_ref[...]      # (C, N)

    # final residual is with the ORIGINAL input (drop_path == identity)
    out_ref[0] = x_in + gamma_ref[...] * h2


# ------------------------------- JAX-side glue --------------------------------

def pos_fourier_features(H, W, hidden_dim=32, temperature=10000.0):
    """Batch-independent Fourier features (H*W, 2*hidden_dim)."""
    scale = 2.0 * math.pi
    eps = 1e-6
    y_embed = jnp.arange(1, H + 1, dtype=jnp.float32)[:, None] * jnp.ones((1, W), jnp.float32)
    x_embed = jnp.ones((H, 1), jnp.float32) * jnp.arange(1, W + 1, dtype=jnp.float32)[None, :]
    y_embed = y_embed / (float(H) + eps) * scale
    x_embed = x_embed / (float(W) + eps) * scale
    dim_t = jnp.arange(hidden_dim, dtype=jnp.float32)
    dim_t = temperature ** (2.0 * jnp.floor(dim_t / 2.0) / hidden_dim)
    pos_x = x_embed[:, :, None] / dim_t
    pos_y = y_embed[:, :, None] / dim_t
    pos_x = jnp.stack([jnp.sin(pos_x[:, :, 0::2]), jnp.cos(pos_x[:, :, 1::2])],
                      axis=-1).reshape(H, W, hidden_dim)
    pos_y = jnp.stack([jnp.sin(pos_y[:, :, 0::2]), jnp.cos(pos_y[:, :, 1::2])],
                      axis=-1).reshape(H, W, hidden_dim)
    pos = jnp.concatenate([pos_y, pos_x], axis=-1)           # (H, W, 2*hidden)
    return pos.reshape(H * W, 2 * hidden_dim)


def init_params(key, dim, num_heads=8, expan_ratio=4, scales=2,
                pos_hidden=32, layer_scale_init_value=1e-6):
    width = max(int(math.ceil(dim / scales)), int(math.floor(dim // scales)))
    nums = 1 if scales == 1 else scales - 1
    # TODO(synk): only scales=2 (single depthwise conv, one pass-through chunk) is
    # supported; the cascading sp = sp + spx[i] chain for scales > 2 is not folded.
    assert nums == 1 and width * 2 == dim, "this kernel supports scales=2 with even dim"
    assert dim % num_heads == 0

    ks = jax.random.split(key, 12)
    rnd = lambda k, shape, s: s * jax.random.normal(k, shape, jnp.float32)

    # depthwise 3x3 filters for the first `width` channels, flattened torch layout
    # (c, dh*3+dw); identity (center tap = 1) for the pass-through channels.
    conv_w = jnp.zeros((dim, 9), jnp.float32)
    conv_w = conv_w.at[:width, :].set(rnd(ks[0], (width, 9), 0.2))
    conv_w = conv_w.at[width:, 4].set(1.0)
    conv_b = jnp.zeros((dim, 1), jnp.float32)
    conv_b = conv_b.at[:width, 0].set(rnd(ks[1], (width,), 0.1))

    return dict(
        conv_w=conv_w, conv_b=conv_b,
        # positional projection (1x1 conv) kept in (in, out) layout; used in wrapper.
        pos_w=rnd(ks[2], (2 * pos_hidden, dim), 1.0 / math.sqrt(2 * pos_hidden)),
        pos_b=rnd(ks[3], (1, dim), 0.02),
        ln1_w=jnp.ones((dim, 1), jnp.float32), ln1_b=jnp.zeros((dim, 1), jnp.float32),
        # all matmul weights in torch (out, in) layout, stored bf16 for the MXU.
        qkv_w=rnd(ks[4], (3 * dim, dim), 1.0 / math.sqrt(dim)).astype(jnp.bfloat16),
        qkv_b=rnd(ks[5], (3 * dim, 1), 0.02),
        temp=jnp.ones((num_heads, 1, 1), jnp.float32),           # module init: ones
        proj_w=rnd(ks[6], (dim, dim), 1.0 / math.sqrt(dim)).astype(jnp.bfloat16),
        proj_b=rnd(ks[7], (dim, 1), 0.02),
        gamma_xca=jnp.full((dim, 1), layer_scale_init_value, jnp.float32),
        ln2_w=jnp.ones((dim, 1), jnp.float32), ln2_b=jnp.zeros((dim, 1), jnp.float32),
        pw1_w=rnd(ks[8], (expan_ratio * dim, dim), 1.0 / math.sqrt(dim)).astype(jnp.bfloat16),
        pw1_b=rnd(ks[9], (expan_ratio * dim, 1), 0.02),
        pw2_w=rnd(ks[10], (dim, expan_ratio * dim),
                  1.0 / math.sqrt(expan_ratio * dim)).astype(jnp.bfloat16),
        pw2_b=rnd(ks[11], (dim, 1), 0.02),
        gamma=jnp.full((dim, 1), layer_scale_init_value, jnp.float32),
    )


def sdta_forward(x_nchw, params, num_heads=8):
    B, C, H, W = x_nchw.shape
    N = H * W
    # channel-major tokens: pure reshape of NCHW, no transpose, single input copy.
    x_cm = x_nchw.reshape(B, C, N).astype(jnp.float32)

    # --- batch-independent precomputations (plain JAX, once per call) ---------
    pos_feat = pos_fourier_features(H, W)                              # (N, 2*hidden)
    pos_cm = (pos_feat @ params['pos_w'] + params['pos_b']).T          # (C, N)
    pos_cm = pos_cm.astype(jnp.float32)

    hh = jnp.arange(H, dtype=jnp.int32)[:, None]
    ww = jnp.arange(W, dtype=jnp.int32)[None, :]
    conv_mask = jnp.stack([
        ((hh + (k // 3 - 1) >= 0) & (hh + (k // 3 - 1) < H) &
         (ww + (k % 3 - 1) >= 0) & (ww + (k % 3 - 1) < W)).reshape(N)
        for k in range(9)]).astype(jnp.float32)                        # (9, N)

    hd = C // num_heads
    head_id = jnp.arange(C, dtype=jnp.int32) // hd
    head_mask = (head_id[:, None] == head_id[None, :]).astype(jnp.float32)   # (C, C)
    temp_row = jnp.repeat(params['temp'].reshape(num_heads), hd).reshape(C, 1)

    weights = [
        params['conv_w'], params['conv_b'], conv_mask, pos_cm,
        params['ln1_w'], params['ln1_b'],
        params['qkv_w'], params['qkv_b'], temp_row, head_mask,
        params['proj_w'], params['proj_b'], params['gamma_xca'],
        params['ln2_w'], params['ln2_b'],
        params['pw1_w'], params['pw1_b'], params['pw2_w'], params['pw2_b'],
        params['gamma'],
    ]

    def full_spec(a):
        nd = a.ndim
        return pl.BlockSpec(a.shape, lambda b, _nd=nd: (0,) * _nd)

    in_specs = [pl.BlockSpec((1, C, N), lambda b: (b, 0, 0))] + [full_spec(w) for w in weights]

    # TODO(synk): for very large images (e.g. N=3136, C=256) on v7x's 64 MiB VMEM,
    # tile the token axis; XCA's Gram contraction over N would then need a
    # two-pass (stats + apply) accumulation scheme.
    out_cm = pl.pallas_call(
        functools.partial(sdta_kernel, H=H, W=W),
        out_shape=jax.ShapeDtypeStruct((B, C, N), jnp.float32),
        grid=(B,),
        in_specs=in_specs,
        out_specs=pl.BlockSpec((1, C, N), lambda b: (b, 0, 0)),
        compiler_params=pltpu.CompilerParams(
            dimension_semantics=("parallel",),          # v7x: shard batch over 2 TCs
            vmem_limit_bytes=48 * 1024 * 1024),
    )(x_cm, *weights)

    # channel-major output IS NCHW after a reshape -- no transpose needed.
    return out_cm.reshape(B, C, H, W)


if __name__ == "__main__":
    B, dim, H, W = 2, 16, 16, 16
    num_heads = 8
    key = jax.random.PRNGKey(0)
    kx, kp = jax.random.split(key)
    x = jax.random.normal(kx, (B, dim, H, W), jnp.float32)
    params = init_params(kp, dim, num_heads=num_heads, expan_ratio=4, scales=2)

    out = sdta_forward(x, params, num_heads=num_heads)
    out = jax.block_until_ready(out)
    assert out.shape == (B, dim, H, W), out.shape
    assert bool(jnp.all(jnp.isfinite(out)))
    print("KERNEL_OK")
</pallas_src>

<mosaic_0001>
module attributes {stable_mosaic.version = 11 : i64} {
  func.func @sdta_kernel(%arg0: i32, %arg1: memref<1x16x256xf32, #tpu.memory_space<vmem>>, %arg2: memref<16x9xf32, #tpu.memory_space<vmem>>, %arg3: memref<16x1xf32, #tpu.memory_space<vmem>>, %arg4: memref<9x256xf32, #tpu.memory_space<vmem>>, %arg5: memref<16x256xf32, #tpu.memory_space<vmem>>, %arg6: memref<16x1xf32, #tpu.memory_space<vmem>>, %arg7: memref<16x1xf32, #tpu.memory_space<vmem>>, %arg8: memref<48x16xbf16, #tpu.memory_space<vmem>>, %arg9: memref<48x1xf32, #tpu.memory_space<vmem>>, %arg10: memref<16x1xf32, #tpu.memory_space<vmem>>, %arg11: memref<16x16xf32, #tpu.memory_space<vmem>>, %arg12: memref<16x16xbf16, #tpu.memory_space<vmem>>, %arg13: memref<16x1xf32, #tpu.memory_space<vmem>>, %arg14: memref<16x1xf32, #tpu.memory_space<vmem>>, %arg15: memref<16x1xf32, #tpu.memory_space<vmem>>, %arg16: memref<16x1xf32, #tpu.memory_space<vmem>>, %arg17: memref<64x16xbf16, #tpu.memory_space<vmem>>, %arg18: memref<64x1xf32, #tpu.memory_space<vmem>>, %arg19: memref<16x64xbf16, #tpu.memory_space<vmem>>, %arg20: memref<16x1xf32, #tpu.memory_space<vmem>>, %arg21: memref<16x1xf32, #tpu.memory_space<vmem>>, %arg22: memref<1x16x256xf32, #tpu.memory_space<vmem>>) attributes {dimension_semantics = [#tpu.dimension_semantics<parallel>], iteration_bounds = array<i64: 2>, scalar_prefetch = 0 : i64, scratch_operands = 0 : i64, tpu.core_type = #tpu.core_type<tc>, window_params = [{transform_indices = @transform_0, window_bounds = array<i64: 1, 16, 256>}, {pipeline_mode = #tpu.pipeline_mode<synchronous>, transform_indices = @transform_1, window_bounds = array<i64: 16, 9>}, {pipeline_mode = #tpu.pipeline_mode<synchronous>, transform_indices = @transform_2, window_bounds = array<i64: 16, 1>}, {pipeline_mode = #tpu.pipeline_mode<synchronous>, transform_indices = @transform_3, window_bounds = array<i64: 9, 256>}, {pipeline_mode = #tpu.pipeline_mode<synchronous>, transform_indices = @transform_4, window_bounds = array<i64: 16, 256>}, {pipeline_mode = #tpu.pipeline_mode<synchronous>, transform_indices = @transform_5, window_bounds = array<i64: 16, 1>}, {pipeline_mode = #tpu.pipeline_mode<synchronous>, transform_indices = @transform_6, window_bounds = array<i64: 16, 1>}, {pipeline_mode = #tpu.pipeline_mode<synchronous>, transform_indices = @transform_7, window_bounds = array<i64: 48, 16>}, {pipeline_mode = #tpu.pipeline_mode<synchronous>, transform_indices = @transform_8, window_bounds = array<i64: 48, 1>}, {pipeline_mode = #tpu.pipeline_mode<synchronous>, transform_indices = @transform_9, window_bounds = array<i64: 16, 1>}, {pipeline_mode = #tpu.pipeline_mode<synchronous>, transform_indices = @transform_10, window_bounds = array<i64: 16, 16>}, {pipeline_mode = #tpu.pipeline_mode<synchronous>, transform_indices = @transform_11, window_bounds = array<i64: 16, 16>}, {pipeline_mode = #tpu.pipeline_mode<synchronous>, transform_indices = @transform_12, window_bounds = array<i64: 16, 1>}, {pipeline_mode = #tpu.pipeline_mode<synchronous>, transform_indices = @transform_13, window_bounds = array<i64: 16, 1>}, {pipeline_mode = #tpu.pipeline_mode<synchronous>, transform_indices = @transform_14, window_bounds = array<i64: 16, 1>}, {pipeline_mode = #tpu.pipeline_mode<synchronous>, transform_indices = @transform_15, window_bounds = array<i64: 16, 1>}, {pipeline_mode = #tpu.pipeline_mode<synchronous>, transform_indices = @transform_16, window_bounds = array<i64: 64, 16>}, {pipeline_mode = #tpu.pipeline_mode<synchronous>, transform_indices = @transform_17, window_bounds = array<i64: 64, 1>}, {pipeline_mode = #tpu.pipeline_mode<synchronous>, transform_indices = @transform_18, window_bounds = array<i64: 16, 64>}, {pipeline_mode = #tpu.pipeline_mode<synchronous>, transform_indices = @transform_19, window_bounds = array<i64: 16, 1>}, {pipeline_mode = #tpu.pipeline_mode<synchronous>, transform_indices = @transform_20, window_bounds = array<i64: 16, 1>}, {transform_indices = @transform_21, window_bounds = array<i64: 1, 16, 256>}]} {
    %c0 = arith.constant 0 : index
    %c0_0 = arith.constant 0 : index
    %c0_1 = arith.constant 0 : index
    %0 = vector.load %arg1[%c0, %c0_0, %c0_1] : memref<1x16x256xf32, #tpu.memory_space<vmem>>, vector<1x16x256xf32>
    %1 = vector.shape_cast %0 : vector<1x16x256xf32> to vector<16x256xf32>
    %c0_2 = arith.constant 0 : index
    %c0_3 = arith.constant 0 : index
    %2 = vector.load %arg2[%c0_2, %c0_3] : memref<16x9xf32, #tpu.memory_space<vmem>>, vector<16x9xf32>
    %c0_4 = arith.constant 0 : index
    %c0_5 = arith.constant 0 : index
    %3 = vector.load %arg4[%c0_4, %c0_5] : memref<9x256xf32, #tpu.memory_space<vmem>>, vector<9x256xf32>
    %4 = vector.extract_strided_slice %2 {offsets = [0, 4], sizes = [16, 1], strides = [1, 1]} : vector<16x9xf32> to vector<16x1xf32>
    %5 = vector.broadcast %4 : vector<16x1xf32> to vector<16x256xf32>
    %6 = arith.mulf %1, %5 : vector<16x256xf32>
    %c17_i32 = arith.constant 17 : i32
    %7 = tpu.dynamic_rotate %1 by %c17_i32 dim 1 : vector<16x256xf32>, i32 -> vector<16x256xf32>
    %8 = vector.extract_strided_slice %3 {offsets = [0, 0], sizes = [1, 256], strides = [1, 1]} : vector<9x256xf32> to vector<1x256xf32>
    %9 = vector.broadcast %8 : vector<1x256xf32> to vector<16x256xf32>
    %10 = arith.mulf %7, %9 : vector<16x256xf32>
    %11 = vector.extract_strided_slice %2 {offsets = [0, 0], sizes = [16, 1], strides = [1, 1]} : vector<16x9xf32> to vector<16x1xf32>
    %12 = vector.broadcast %11 : vector<16x1xf32> to vector<16x256xf32>
    %13 = arith.mulf %10, %12 : vector<16x256xf32>
    %14 = arith.addf %6, %13 : vector<16x256xf32>
    %c16_i32 = arith.constant 16 : i32
    %15 = tpu.dynamic_rotate %1 by %c16_i32 dim 1 : vector<16x256xf32>, i32 -> vector<16x256xf32>
    %16 = vector.extract_strided_slice %3 {offsets = [1, 0], sizes = [1, 256], strides = [1, 1]} : vector<9x256xf32> to vector<1x256xf32>
    %17 = vector.broadcast %16 : vector<1x256xf32> to vector<16x256xf32>
    %18 = arith.mulf %15, %17 : vector<16x256xf32>
    %19 = vector.extract_strided_slice %2 {offsets = [0, 1], sizes = [16, 1], strides = [1, 1]} : vector<16x9xf32> to vector<16x1xf32>
    %20 = vector.broadcast %19 : vector<16x1xf32> to vector<16x256xf32>
    %21 = arith.mulf %18, %20 : vector<16x256xf32>
    %22 = arith.addf %14, %21 : vector<16x256xf32>
    %c15_i32 = arith.constant 15 : i32
    %23 = tpu.dynamic_rotate %1 by %c15_i32 dim 1 : vector<16x256xf32>, i32 -> vector<16x256xf32>
    %24 = vector.extract_strided_slice %3 {offsets = [2, 0], sizes = [1, 256], strides = [1, 1]} : vector<9x256xf32> to vector<1x256xf32>
    %25 = vector.broadcast %24 : vector<1x256xf32> to vector<16x256xf32>
    %26 = arith.mulf %23, %25 : vector<16x256xf32>
    %27 = vector.extract_strided_slice %2 {offsets = [0, 2], sizes = [16, 1], strides = [1, 1]} : vector<16x9xf32> to vector<16x1xf32>
    %28 = vector.broadcast %27 : vector<16x1xf32> to vector<16x256xf32>
    %29 = arith.mulf %26, %28 : vector<16x256xf32>
    %30 = arith.addf %22, %29 : vector<16x256xf32>
    %c1_i32 = arith.constant 1 : i32
    %31 = tpu.dynamic_rotate %1 by %c1_i32 dim 1 : vector<16x256xf32>, i32 -> vector<16x256xf32>
    %32 = vector.extract_strided_slice %3 {offsets = [3, 0], sizes = [1, 256], strides = [1, 1]} : vector<9x256xf32> to vector<1x256xf32>
    %33 = vector.broadcast %32 : vector<1x256xf32> to vector<16x256xf32>
    %34 = arith.mulf %31, %33 : vector<16x256xf32>
    %35 = vector.extract_strided_slice %2 {offsets = [0, 3], sizes = [16, 1], strides = [1, 1]} : vector<16x9xf32> to vector<16x1xf32>
    %36 = vector.broadcast %35 : vector<16x1xf32> to vector<16x256xf32>
    %37 = arith.mulf %34, %36 : vector<16x256xf32>
    %38 = arith.addf %30, %37 : vector<16x256xf32>
    %c255_i32 = arith.constant 255 : i32
    %39 = tpu.dynamic_rotate %1 by %c255_i32 dim 1 : vector<16x256xf32>, i32 -> vector<16x256xf32>
    %40 = vector.extract_strided_slice %3 {offsets = [5, 0], sizes = [1, 256], strides = [1, 1]} : vector<9x256xf32> to vector<1x256xf32>
    %41 = vector.broadcast %40 : vector<1x256xf32> to vector<16x256xf32>
    %42 = arith.mulf %39, %41 : vector<16x256xf32>
    %43 = vector.extract_strided_slice %2 {offsets = [0, 5], sizes = [16, 1], strides = [1, 1]} : vector<16x9xf32> to vector<16x1xf32>
    %44 = vector.broadcast %43 : vector<16x1xf32> to vector<16x256xf32>
    %45 = arith.mulf %42, %44 : vector<16x256xf32>
    %46 = arith.addf %38, %45 : vector<16x256xf32>
    %c241_i32 = arith.constant 241 : i32
    %47 = tpu.dynamic_rotate %1 by %c241_i32 dim 1 : vector<16x256xf32>, i32 -> vector<16x256xf32>
    %48 = vector.extract_strided_slice %3 {offsets = [6, 0], sizes = [1, 256], strides = [1, 1]} : vector<9x256xf32> to vector<1x256xf32>
    %49 = vector.broadcast %48 : vector<1x256xf32> to vector<16x256xf32>
    %50 = arith.mulf %47, %49 : vector<16x256xf32>
    %51 = vector.extract_strided_slice %2 {offsets = [0, 6], sizes = [16, 1], strides = [1, 1]} : vector<16x9xf32> to vector<16x1xf32>
    %52 = vector.broadcast %51 : vector<16x1xf32> to vector<16x256xf32>
    %53 = arith.mulf %50, %52 : vector<16x256xf32>
    %54 = arith.addf %46, %53 : vector<16x256xf32>
    %c240_i32 = arith.constant 240 : i32
    %55 = tpu.dynamic_rotate %1 by %c240_i32 dim 1 : vector<16x256xf32>, i32 -> vector<16x256xf32>
    %56 = vector.extract_strided_slice %3 {offsets = [7, 0], sizes = [1, 256], strides = [1, 1]} : vector<9x256xf32> to vector<1x256xf32>
    %57 = vector.broadcast %56 : vector<1x256xf32> to vector<16x256xf32>
    %58 = arith.mulf %55, %57 : vector<16x256xf32>
    %59 = vector.extract_strided_slice %2 {offsets = [0, 7], sizes = [16, 1], strides = [1, 1]} : vector<16x9xf32> to vector<16x1xf32>
    %60 = vector.broadcast %59 : vector<16x1xf32> to vector<16x256xf32>
    %61 = arith.mulf %58, %60 : vector<16x256xf32>
    %62 = arith.addf %54, %61 : vector<16x256xf32>
    %c239_i32 = arith.constant 239 : i32
    %63 = tpu.dynamic_rotate %1 by %c239_i32 dim 1 : vector<16x256xf32>, i32 -> vector<16x256xf32>
    %64 = vector.extract_strided_slice %3 {offsets = [8, 0], sizes = [1, 256], strides = [1, 1]} : vector<9x256xf32> to vector<1x256xf32>
    %65 = vector.broadcast %64 : vector<1x256xf32> to vector<16x256xf32>
    %66 = arith.mulf %63, %65 : vector<16x256xf32>
    %67 = vector.extract_strided_slice %2 {offsets = [0, 8], sizes = [16, 1], strides = [1, 1]} : vector<16x9xf32> to vector<16x1xf32>
    %68 = vector.broadcast %67 : vector<16x1xf32> to vector<16x256xf32>
    %69 = arith.mulf %66, %68 : vector<16x256xf32>
    %70 = arith.addf %62, %69 : vector<16x256xf32>
    %c0_6 = arith.constant 0 : index
    %c0_7 = arith.constant 0 : index
    %71 = vector.load %arg3[%c0_6, %c0_7] : memref<16x1xf32, #tpu.memory_space<vmem>>, vector<16x1xf32>
    %72 = vector.broadcast %71 : vector<16x1xf32> to vector<16x256xf32>
    %73 = arith.addf %70, %72 : vector<16x256xf32>
    %c0_8 = arith.constant 0 : index
    %c0_9 = arith.constant 0 : index
    %74 = vector.load %arg5[%c0_8, %c0_9] : memref<16x256xf32, #tpu.memory_space<vmem>>, vector<16x256xf32>
    %75 = arith.addf %73, %74 : vector<16x256xf32>
    %c0_10 = arith.constant 0 : index
    %c0_11 = arith.constant 0 : index
    %76 = vector.load %arg6[%c0_10, %c0_11] : memref<16x1xf32, #tpu.memory_space<vmem>>, vector<16x1xf32>
    %c0_12 = arith.constant 0 : index
    %c0_13 = arith.constant 0 : index
    %77 = vector.load %arg7[%c0_12, %c0_13] : memref<16x1xf32, #tpu.memory_space<vmem>>, vector<16x1xf32>
    %cst = arith.constant dense<0.000000e+00> : vector<256xf32>
    %78 = vector.multi_reduction <add>, %75, %cst [0] : vector<16x256xf32> to vector<256xf32>
    %79 = vector.shape_cast %78 : vector<256xf32> to vector<1x256xf32>
    %cst_14 = arith.constant 1.600000e+01 : f32
    %80 = vector.broadcast %cst_14 : f32 to vector<1x256xf32>
    %81 = arith.divf %79, %80 : vector<1x256xf32>
    %82 = vector.broadcast %81 : vector<1x256xf32> to vector<16x256xf32>
    %83 = arith.subf %75, %82 : vector<16x256xf32>
    %84 = arith.mulf %83, %83 : vector<16x256xf32>
    %cst_15 = arith.constant dense<0.000000e+00> : vector<256xf32>
    %85 = vector.multi_reduction <add>, %84, %cst_15 [0] : vector<16x256xf32> to vector<256xf32>
    %86 = vector.shape_cast %85 : vector<256xf32> to vector<1x256xf32>
    %cst_16 = arith.constant 1.600000e+01 : f32
    %87 = vector.broadcast %cst_16 : f32 to vector<1x256xf32>
    %88 = arith.divf %86, %87 : vector<1x256xf32>
    %cst_17 = arith.constant 9.99999997E-7 : f32
    %89 = vector.broadcast %cst_17 : f32 to vector<1x256xf32>
    %90 = arith.addf %88, %89 : vector<1x256xf32>
    %91 = math.rsqrt %90 : vector<1x256xf32>
    %92 = vector.broadcast %91 : vector<1x256xf32> to vector<16x256xf32>
    %93 = arith.mulf %83, %92 : vector<16x256xf32>
    %94 = vector.broadcast %76 : vector<16x1xf32> to vector<16x256xf32>
    %95 = arith.mulf %93, %94 : vector<16x256xf32>
    %96 = vector.broadcast %77 : vector<16x1xf32> to vector<16x256xf32>
    %97 = arith.addf %95, %96 : vector<16x256xf32>
    %c0_18 = arith.constant 0 : index
    %c0_19 = arith.constant 0 : index
    %98 = vector.load %arg8[%c0_18, %c0_19] : memref<48x16xbf16, #tpu.memory_space<vmem>>, vector<48x16xbf16>
    %99 = arith.truncf %97 : vector<16x256xf32> to vector<16x256xbf16>
    %cst_20 = arith.constant dense<0.000000e+00> : vector<48x256xf32>
    %100 = tpu.matmul %98, %99, %cst_20 {dimension_numbers = #tpu.dot_dimension_numbers<[1], [0], [0], [1], [0, 0, 1, 1], [], []>} : vector<48x16xbf16>, vector<16x256xbf16>, vector<48x256xf32> -> vector<48x256xf32>
    %c0_21 = arith.constant 0 : index
    %c0_22 = arith.constant 0 : index
    %101 = vector.load %arg9[%c0_21, %c0_22] : memref<48x1xf32, #tpu.memory_space<vmem>>, vector<48x1xf32>
    %102 = vector.broadcast %101 : vector<48x1xf32> to vector<48x256xf32>
    %103 = arith.addf %100, %102 : vector<48x256xf32>
    %104 = vector.extract_strided_slice %103 {offsets = [0, 0], sizes = [16, 256], strides = [1, 1]} : vector<48x256xf32> to vector<16x256xf32>
    %105 = vector.extract_strided_slice %103 {offsets = [16, 0], sizes = [16, 256], strides = [1, 1]} : vector<48x256xf32> to vector<16x256xf32>
    %106 = vector.extract_strided_slice %103 {offsets = [32, 0], sizes = [16, 256], strides = [1, 1]} : vector<48x256xf32> to vector<16x256xf32>
    %107 = arith.mulf %104, %104 : vector<16x256xf32>
    %cst_23 = arith.constant dense<0.000000e+00> : vector<16xf32>
    %108 = vector.multi_reduction <add>, %107, %cst_23 [1] : vector<16x256xf32> to vector<16xf32>
    %109 = vector.shape_cast %108 : vector<16xf32> to vector<16x1xf32>
    %110 = math.sqrt %109 : vector<16x1xf32>
    %cst_24 = arith.constant 9.99999996E-13 : f32
    %111 = vector.broadcast %cst_24 : f32 to vector<16x1xf32>
    %112 = arith.maximumf %110, %111 : vector<16x1xf32>
    %113 = vector.broadcast %112 : vector<16x1xf32> to vector<16x256xf32>
    %114 = arith.divf %104, %113 : vector<16x256xf32>
    %115 = arith.mulf %105, %105 : vector<16x256xf32>
    %cst_25 = arith.constant dense<0.000000e+00> : vector<16xf32>
    %116 = vector.multi_reduction <add>, %115, %cst_25 [1] : vector<16x256xf32> to vector<16xf32>
    %117 = vector.shape_cast %116 : vector<16xf32> to vector<16x1xf32>
    %118 = math.sqrt %117 : vector<16x1xf32>
    %cst_26 = arith.constant 9.99999996E-13 : f32
    %119 = vector.broadcast %cst_26 : f32 to vector<16x1xf32>
    %120 = arith.maximumf %118, %119 : vector<16x1xf32>
    %121 = vector.broadcast %120 : vector<16x1xf32> to vector<16x256xf32>
    %122 = arith.divf %105, %121 : vector<16x256xf32>
    %123 = arith.truncf %114 : vector<16x256xf32> to vector<16x256xbf16>
    %124 = arith.truncf %122 : vector<16x256xf32> to vector<16x256xbf16>
    %cst_27 = arith.constant dense<0.000000e+00> : vector<16x16xf32>
    %125 = tpu.matmul %123, %124, %cst_27 {dimension_numbers = #tpu.dot_dimension_numbers<[1], [1], [0], [0], [0, 0, 1, 0], [], []>} : vector<16x256xbf16>, vector<16x256xbf16>, vector<16x16xf32> -> vector<16x16xf32>
    %c0_28 = arith.constant 0 : index
    %c0_29 = arith.constant 0 : index
    %126 = vector.load %arg11[%c0_28, %c0_29] : memref<16x16xf32, #tpu.memory_space<vmem>>, vector<16x16xf32>
    %c0_30 = arith.constant 0 : index
    %c0_31 = arith.constant 0 : index
    %127 = vector.load %arg10[%c0_30, %c0_31] : memref<16x1xf32, #tpu.memory_space<vmem>>, vector<16x1xf32>
    %128 = vector.broadcast %127 : vector<16x1xf32> to vector<16x16xf32>
    %129 = arith.mulf %125, %128 : vector<16x16xf32>
    %130 = arith.mulf %129, %126 : vector<16x16xf32>
    %cst_32 = arith.constant 1.000000e+00 : f32
    %131 = vector.broadcast %cst_32 : f32 to vector<16x16xf32>
    %132 = arith.subf %131, %126 : vector<16x16xf32>
    %cst_33 = arith.constant 1.000000e+30 : f32
    %133 = vector.broadcast %cst_33 : f32 to vector<16x16xf32>
    %134 = arith.mulf %132, %133 : vector<16x16xf32>
    %135 = arith.subf %130, %134 : vector<16x16xf32>
    %cst_34 = arith.constant dense<0xFF800000> : vector<16xf32>
    %136 = vector.multi_reduction <maximumf>, %135, %cst_34 [1] : vector<16x16xf32> to vector<16xf32>
    %137 = vector.shape_cast %136 : vector<16xf32> to vector<16x1xf32>
    %138 = vector.broadcast %137 : vector<16x1xf32> to vector<16x16xf32>
    %139 = arith.subf %135, %138 : vector<16x16xf32>
    %140 = math.exp %139 : vector<16x16xf32>
    %cst_35 = arith.constant dense<0.000000e+00> : vector<16xf32>
    %141 = vector.multi_reduction <add>, %140, %cst_35 [1] : vector<16x16xf32> to vector<16xf32>
    %142 = vector.shape_cast %141 : vector<16xf32> to vector<16x1xf32>
    %143 = vector.broadcast %142 : vector<16x1xf32> to vector<16x16xf32>
    %144 = arith.divf %140, %143 : vector<16x16xf32>
    %145 = arith.truncf %144 : vector<16x16xf32> to vector<16x16xbf16>
    %146 = arith.truncf %106 : vector<16x256xf32> to vector<16x256xbf16>
    %cst_36 = arith.constant dense<0.000000e+00> : vector<16x256xf32>
    %147 = tpu.matmul %145, %146, %cst_36 {dimension_numbers = #tpu.dot_dimension_numbers<[1], [0], [0], [1], [0, 0, 1, 1], [], []>} : vector<16x16xbf16>, vector<16x256xbf16>, vector<16x256xf32> -> vector<16x256xf32>
    %c0_37 = arith.constant 0 : index
    %c0_38 = arith.constant 0 : index
    %148 = vector.load %arg12[%c0_37, %c0_38] : memref<16x16xbf16, #tpu.memory_space<vmem>>, vector<16x16xbf16>
    %149 = arith.truncf %147 : vector<16x256xf32> to vector<16x256xbf16>
    %cst_39 = arith.constant dense<0.000000e+00> : vector<16x256xf32>
    %150 = tpu.matmul %148, %149, %cst_39 {dimension_numbers = #tpu.dot_dimension_numbers<[1], [0], [0], [1], [0, 0, 1, 1], [], []>} : vector<16x16xbf16>, vector<16x256xbf16>, vector<16x256xf32> -> vector<16x256xf32>
    %c0_40 = arith.constant 0 : index
    %c0_41 = arith.constant 0 : index
    %151 = vector.load %arg13[%c0_40, %c0_41] : memref<16x1xf32, #tpu.memory_space<vmem>>, vector<16x1xf32>
    %152 = vector.broadcast %151 : vector<16x1xf32> to vector<16x256xf32>
    %153 = arith.addf %150, %152 : vector<16x256xf32>
    %c0_42 = arith.constant 0 : index
    %c0_43 = arith.constant 0 : index
    %154 = vector.load %arg14[%c0_42, %c0_43] : memref<16x1xf32, #tpu.memory_space<vmem>>, vector<16x1xf32>
    %155 = vector.broadcast %154 : vector<16x1xf32> to vector<16x256xf32>
    %156 = arith.mulf %155, %153 : vector<16x256xf32>
    %157 = arith.addf %75, %156 : vector<16x256xf32>
    %c0_44 = arith.constant 0 : index
    %c0_45 = arith.constant 0 : index
    %158 = vector.load %arg15[%c0_44, %c0_45] : memref<16x1xf32, #tpu.memory_space<vmem>>, vector<16x1xf32>
    %c0_46 = arith.constant 0 : index
    %c0_47 = arith.constant 0 : index
    %159 = vector.load %arg16[%c0_46, %c0_47] : memref<16x1xf32, #tpu.memory_space<vmem>>, vector<16x1xf32>
    %cst_48 = arith.constant dense<0.000000e+00> : vector<256xf32>
    %160 = vector.multi_reduction <add>, %157, %cst_48 [0] : vector<16x256xf32> to vector<256xf32>
    %161 = vector.shape_cast %160 : vector<256xf32> to vector<1x256xf32>
    %cst_49 = arith.constant 1.600000e+01 : f32
    %162 = vector.broadcast %cst_49 : f32 to vector<1x256xf32>
    %163 = arith.divf %161, %162 : vector<1x256xf32>
    %164 = vector.broadcast %163 : vector<1x256xf32> to vector<16x256xf32>
    %165 = arith.subf %157, %164 : vector<16x256xf32>
    %166 = arith.mulf %165, %165 : vector<16x256xf32>
    %cst_50 = arith.constant dense<0.000000e+00> : vector<256xf32>
    %167 = vector.multi_reduction <add>, %166, %cst_50 [0] : vector<16x256xf32> to vector<256xf32>
    %168 = vector.shape_cast %167 : vector<256xf32> to vector<1x256xf32>
    %cst_51 = arith.constant 1.600000e+01 : f32
    %169 = vector.broadcast %cst_51 : f32 to vector<1x256xf32>
    %170 = arith.divf %168, %169 : vector<1x256xf32>
    %cst_52 = arith.constant 9.99999997E-7 : f32
    %171 = vector.broadcast %cst_52 : f32 to vector<1x256xf32>
    %172 = arith.addf %170, %171 : vector<1x256xf32>
    %173 = math.rsqrt %172 : vector<1x256xf32>
    %174 = vector.broadcast %173 : vector<1x256xf32> to vector<16x256xf32>
    %175 = arith.mulf %165, %174 : vector<16x256xf32>
    %176 = vector.broadcast %158 : vector<16x1xf32> to vector<16x256xf32>
    %177 = arith.mulf %175, %176 : vector<16x256xf32>
    %178 = vector.broadcast %159 : vector<16x1xf32> to vector<16x256xf32>
    %179 = arith.addf %177, %178 : vector<16x256xf32>
    %c0_53 = arith.constant 0 : index
    %c0_54 = arith.constant 0 : index
    %180 = vector.load %arg17[%c0_53, %c0_54] : memref<64x16xbf16, #tpu.memory_space<vmem>>, vector<64x16xbf16>
    %181 = arith.truncf %179 : vector<16x256xf32> to vector<16x256xbf16>
    %cst_55 = arith.constant dense<0.000000e+00> : vector<64x256xf32>
    %182 = tpu.matmul %180, %181, %cst_55 {dimension_numbers = #tpu.dot_dimension_numbers<[1], [0], [0], [1], [0, 0, 1, 1], [], []>} : vector<64x16xbf16>, vector<16x256xbf16>, vector<64x256xf32> -> vector<64x256xf32>
    %c0_56 = arith.constant 0 : index
    %c0_57 = arith.constant 0 : index
    %183 = vector.load %arg18[%c0_56, %c0_57] : memref<64x1xf32, #tpu.memory_space<vmem>>, vector<64x1xf32>
    %184 = vector.broadcast %183 : vector<64x1xf32> to vector<64x256xf32>
    %185 = arith.addf %182, %184 : vector<64x256xf32>
    %cst_58 = arith.constant 5.000000e-01 : f32
    %186 = vector.broadcast %cst_58 : f32 to vector<64x256xf32>
    %187 = arith.mulf %186, %185 : vector<64x256xf32>
    %cst_59 = arith.constant 0.707106769 : f32
    %188 = vector.broadcast %cst_59 : f32 to vector<64x256xf32>
    %189 = arith.mulf %185, %188 : vector<64x256xf32>
    %cst_60 = arith.constant 0.000000e+00 : f32
    %190 = vector.broadcast %cst_60 : f32 to vector<64x256xf32>
    %191 = arith.cmpf oge, %189, %190 : vector<64x256xf32>
    %cst_61 = arith.constant 1.000000e+00 : f32
    %cst_62 = arith.constant -1.000000e+00 : f32
    %192 = vector.broadcast %cst_61 : f32 to vector<64x256xf32>
    %193 = vector.broadcast %cst_62 : f32 to vector<64x256xf32>
    %194 = arith.select %191, %192, %193 : vector<64x256xi1>, vector<64x256xf32>
    %195 = math.absf %189 : vector<64x256xf32>
    %cst_63 = arith.constant 0.327591091 : f32
    %196 = vector.broadcast %cst_63 : f32 to vector<64x256xf32>
    %197 = arith.mulf %196, %195 : vector<64x256xf32>
    %cst_64 = arith.constant 1.000000e+00 : f32
    %198 = vector.broadcast %cst_64 : f32 to vector<64x256xf32>
    %199 = arith.addf %198, %197 : vector<64x256xf32>
    %cst_65 = arith.constant 1.000000e+00 : f32
    %200 = vector.broadcast %cst_65 : f32 to vector<64x256xf32>
    %201 = arith.divf %200, %199 : vector<64x256xf32>
    %cst_66 = arith.constant 1.06140542 : f32
    %202 = vector.broadcast %cst_66 : f32 to vector<64x256xf32>
    %203 = arith.mulf %202, %201 : vector<64x256xf32>
    %cst_67 = arith.constant -1.45315206 : f32
    %204 = vector.broadcast %cst_67 : f32 to vector<64x256xf32>
    %205 = arith.addf %203, %204 : vector<64x256xf32>
    %206 = arith.mulf %205, %201 : vector<64x256xf32>
    %cst_68 = arith.constant 1.42141378 : f32
    %207 = vector.broadcast %cst_68 : f32 to vector<64x256xf32>
    %208 = arith.addf %206, %207 : vector<64x256xf32>
    %209 = arith.mulf %208, %201 : vector<64x256xf32>
    %cst_69 = arith.constant -0.284496725 : f32
    %210 = vector.broadcast %cst_69 : f32 to vector<64x256xf32>
    %211 = arith.addf %209, %210 : vector<64x256xf32>
    %212 = arith.mulf %211, %201 : vector<64x256xf32>
    %cst_70 = arith.constant 0.254829586 : f32
    %213 = vector.broadcast %cst_70 : f32 to vector<64x256xf32>
    %214 = arith.addf %212, %213 : vector<64x256xf32>
    %215 = arith.mulf %214, %201 : vector<64x256xf32>
    %cst_71 = arith.constant 0.000000e+00 : f32
    %216 = vector.broadcast %cst_71 : f32 to vector<64x256xf32>
    %217 = arith.subf %216, %195 : vector<64x256xf32>
    %218 = arith.mulf %217, %195 : vector<64x256xf32>
    %219 = math.exp %218 : vector<64x256xf32>
    %220 = arith.mulf %215, %219 : vector<64x256xf32>
    %cst_72 = arith.constant 1.000000e+00 : f32
    %221 = vector.broadcast %cst_72 : f32 to vector<64x256xf32>
    %222 = arith.subf %221, %220 : vector<64x256xf32>
    %223 = arith.mulf %194, %222 : vector<64x256xf32>
    %cst_73 = arith.constant 1.000000e+00 : f32
    %224 = vector.broadcast %cst_73 : f32 to vector<64x256xf32>
    %225 = arith.addf %224, %223 : vector<64x256xf32>
    %226 = arith.mulf %187, %225 : vector<64x256xf32>
    %c0_74 = arith.constant 0 : index
    %c0_75 = arith.constant 0 : index
    %227 = vector.load %arg19[%c0_74, %c0_75] : memref<16x64xbf16, #tpu.memory_space<vmem>>, vector<16x64xbf16>
    %228 = arith.truncf %226 : vector<64x256xf32> to vector<64x256xbf16>
    %cst_76 = arith.constant dense<0.000000e+00> : vector<16x256xf32>
    %229 = tpu.matmul %227, %228, %cst_76 {dimension_numbers = #tpu.dot_dimension_numbers<[1], [0], [0], [1], [0, 0, 1, 1], [], []>} : vector<16x64xbf16>, vector<64x256xbf16>, vector<16x256xf32> -> vector<16x256xf32>
    %c0_77 = arith.constant 0 : index
    %c0_78 = arith.constant 0 : index
    %230 = vector.load %arg20[%c0_77, %c0_78] : memref<16x1xf32, #tpu.memory_space<vmem>>, vector<16x1xf32>
    %231 = vector.broadcast %230 : vector<16x1xf32> to vector<16x256xf32>
    %232 = arith.addf %229, %231 : vector<16x256xf32>
    %c0_79 = arith.constant 0 : index
    %c0_80 = arith.constant 0 : index
    %233 = vector.load %arg21[%c0_79, %c0_80] : memref<16x1xf32, #tpu.memory_space<vmem>>, vector<16x1xf32>
    %234 = vector.broadcast %233 : vector<16x1xf32> to vector<16x256xf32>
    %235 = arith.mulf %234, %232 : vector<16x256xf32>
    %236 = arith.addf %1, %235 : vector<16x256xf32>
    %c0_81 = arith.constant 0 : index
    %c0_82 = arith.constant 0 : index
    %c0_83 = arith.constant 0 : index
    %237 = vector.load %arg22[%c0_81, %c0_82, %c0_83] : memref<1x16x256xf32, #tpu.memory_space<vmem>>, vector<1x16x256xf32>
    %238 = vector.shape_cast %237 : vector<1x16x256xf32> to vector<16x256xf32>
    %239 = vector.shape_cast %236 : vector<16x256xf32> to vector<1x16x256xf32>
    tpu.vector_store %arg22[%c0_81, %c0_82, %c0_83], %239 {strides = array<i32>} : memref<1x16x256xf32, #tpu.memory_space<vmem>>, vector<1x16x256xf32>,
    return
  }
  func.func @transform_0(%arg0: i32) -> (i32, i32, i32) {
    %c0_i32 = arith.constant 0 : i32
    %c0_i32_0 = arith.constant 0 : i32
    %c0_i32_1 = arith.constant 0 : i32
    return %arg0, %c0_i32, %c0_i32_0 : i32, i32, i32
  }
  func.func @transform_1(%arg0: i32) -> (i32, i32) {
    %c0_i32 = arith.constant 0 : i32
    %c0_i32_0 = arith.constant 0 : i32
    %c0_i32_1 = arith.constant 0 : i32
    return %c0_i32, %c0_i32_0 : i32, i32
  }
  func.func @transform_2(%arg0: i32) -> (i32, i32) {
    %c0_i32 = arith.constant 0 : i32
    %c0_i32_0 = arith.constant 0 : i32
    %c0_i32_1 = arith.constant 0 : i32
    return %c0_i32, %c0_i32_0 : i32, i32
  }
  func.func @transform_3(%arg0: i32) -> (i32, i32) {
    %c0_i32 = arith.constant 0 : i32
    %c0_i32_0 = arith.constant 0 : i32
    %c0_i32_1 = arith.constant 0 : i32
    return %c0_i32, %c0_i32_0 : i32, i32
  }
  func.func @transform_4(%arg0: i32) -> (i32, i32) {
    %c0_i32 = arith.constant 0 : i32
    %c0_i32_0 = arith.constant 0 : i32
    %c0_i32_1 = arith.constant 0 : i32
    return %c0_i32, %c0_i32_0 : i32, i32
  }
  func.func @transform_5(%arg0: i32) -> (i32, i32) {
    %c0_i32 = arith.constant 0 : i32
    %c0_i32_0 = arith.constant 0 : i32
    %c0_i32_1 = arith.constant 0 : i32
    return %c0_i32, %c0_i32_0 : i32, i32
  }
  func.func @transform_6(%arg0: i32) -> (i32, i32) {
    %c0_i32 = arith.constant 0 : i32
    %c0_i32_0 = arith.constant 0 : i32
    %c0_i32_1 = arith.constant 0 : i32
    return %c0_i32, %c0_i32_0 : i32, i32
  }
  func.func @transform_7(%arg0: i32) -> (i32, i32) {
    %c0_i32 = arith.constant 0 : i32
    %c0_i32_0 = arith.constant 0 : i32
    %c0_i32_1 = arith.constant 0 : i32
    return %c0_i32, %c0_i32_0 : i32, i32
  }
  func.func @transform_8(%arg0: i32) -> (i32, i32) {
    %c0_i32 = arith.constant 0 : i32
    %c0_i32_0 = arith.constant 0 : i32
    %c0_i32_1 = arith.constant 0 : i32
    return %c0_i32, %c0_i32_0 : i32, i32
  }
  func.func @transform_9(%arg0: i32) -> (i32, i32) {
    %c0_i32 = arith.constant 0 : i32
    %c0_i32_0 = arith.constant 0 : i32
    %c0_i32_1 = arith.constant 0 : i32
    return %c0_i32, %c0_i32_0 : i32, i32
  }
  func.func @transform_10(%arg0: i32) -> (i32, i32) {
    %c0_i32 = arith.constant 0 : i32
    %c0_i32_0 = arith.constant 0 : i32
    %c0_i32_1 = arith.constant 0 : i32
    return %c0_i32, %c0_i32_0 : i32, i32
  }
  func.func @transform_11(%arg0: i32) -> (i32, i32) {
    %c0_i32 = arith.constant 0 : i32
    %c0_i32_0 = arith.constant 0 : i32
    %c0_i32_1 = arith.constant 0 : i32
    return %c0_i32, %c0_i32_0 : i32, i32
  }
  func.func @transform_12(%arg0: i32) -> (i32, i32) {
    %c0_i32 = arith.constant 0 : i32
    %c0_i32_0 = arith.constant 0 : i32
    %c0_i32_1 = arith.constant 0 : i32
    return %c0_i32, %c0_i32_0 : i32, i32
  }
  func.func @transform_13(%arg0: i32) -> (i32, i32) {
    %c0_i32 = arith.constant 0 : i32
    %c0_i32_0 = arith.constant 0 : i32
    %c0_i32_1 = arith.constant 0 : i32
    return %c0_i32, %c0_i32_0 : i32, i32
  }
  func.func @transform_14(%arg0: i32) -> (i32, i32) {
    %c0_i32 = arith.constant 0 : i32
    %c0_i32_0 = arith.constant 0 : i32
    %c0_i32_1 = arith.constant 0 : i32
    return %c0_i32, %c0_i32_0 : i32, i32
  }
  func.func @transform_15(%arg0: i32) -> (i32, i32) {
    %c0_i32 = arith.constant 0 : i32
    %c0_i32_0 = arith.constant 0 : i32
    %c0_i32_1 = arith.constant 0 : i32
    return %c0_i32, %c0_i32_0 : i32, i32
  }
  func.func @transform_16(%arg0: i32) -> (i32, i32) {
    %c0_i32 = arith.constant 0 : i32
    %c0_i32_0 = arith.constant 0 : i32
    %c0_i32_1 = arith.constant 0 : i32
    return %c0_i32, %c0_i32_0 : i32, i32
  }
  func.func @transform_17(%arg0: i32) -> (i32, i32) {
    %c0_i32 = arith.constant 0 : i32
    %c0_i32_0 = arith.constant 0 : i32
    %c0_i32_1 = arith.constant 0 : i32
    return %c0_i32, %c0_i32_0 : i32, i32
  }
  func.func @transform_18(%arg0: i32) -> (i32, i32) {
    %c0_i32 = arith.constant 0 : i32
    %c0_i32_0 = arith.constant 0 : i32
    %c0_i32_1 = arith.constant 0 : i32
    return %c0_i32, %c0_i32_0 : i32, i32
  }
  func.func @transform_19(%arg0: i32) -> (i32, i32) {
    %c0_i32 = arith.constant 0 : i32
    %c0_i32_0 = arith.constant 0 : i32
    %c0_i32_1 = arith.constant 0 : i32
    return %c0_i32, %c0_i32_0 : i32, i32
  }
  func.func @transform_20(%arg0: i32) -> (i32, i32) {
    %c0_i32 = arith.constant 0 : i32
    %c0_i32_0 = arith.constant 0 : i32
    %c0_i32_1 = arith.constant 0 : i32
    return %c0_i32, %c0_i32_0 : i32, i32
  }
  func.func @transform_21(%arg0: i32) -> (i32, i32, i32) {
    %c0_i32 = arith.constant 0 : i32
    %c0_i32_0 = arith.constant 0 : i32
    %c0_i32_1 = arith.constant 0 : i32
    return %arg0, %c0_i32, %c0_i32_0 : i32, i32, i32
  }
}

</mosaic_0001>

<bundles_post_ra>
// kernel: tpu_custom_call.1
= control target key start
LH: loop header
LB: loop body
LE: loop exit
PB: predicated region body
PF: predicated region fallthrough
CT: control target
= control target key end

     0   :  { %s3806_s0 = inlined_call_operand.vmem [shape: f32[2,16,256], index: 0, kind: input, shape index: {}]   ;;  %s3807_s1 = inlined_call_operand.vmem [shape: f32[16,9], index: 1, kind: input, shape index: {}]   ;;  %s3808_s2 = inlined_call_operand.vmem [shape: f32[16,1], index: 2, kind: input, shape index: {}]   ;;  %s3809_s3 = inlined_call_operand.vmem [shape: f32[9,256], index: 3, kind: input, shape index: {}]   ;;  %s3810_s4 = inlined_call_operand.vmem [shape: f32[16,256], index: 4, kind: input, shape index: {}]   ;;  %s3811_s5 = inlined_call_operand.vmem [shape: f32[16,1], index: 5, kind: input, shape index: {}]   ;;  %s3812_s6 = inlined_call_operand.vmem [shape: f32[16,1], index: 6, kind: input, shape index: {}]   ;;  %s3813_s7 = inlined_call_operand.vmem [shape: bf16[48,16], index: 7, kind: input, shape index: {}]   ;;  %s3814_s8 = inlined_call_operand.vmem [shape: f32[48,1], index: 8, kind: input, shape index: {}]   ;;  %s3815_s9 = inlined_call_operand.vmem [shape: f32[16,1], index: 9, kind: input, shape index: {}]   ;;  %s3816_s10 = inlined_call_operand.vmem [shape: f32[16,16], index: 10, kind: input, shape index: {}]   ;;  %s3817_s11 = inlined_call_operand.vmem [shape: bf16[16,16], index: 11, kind: input, shape index: {}]   ;;  %s3818_s12 = inlined_call_operand.vmem [shape: f32[16,1], index: 12, kind: input, shape index: {}]   ;;  %s3819_s13 = inlined_call_operand.vmem [shape: f32[16,1], index: 13, kind: input, shape index: {}]   ;;  %s3820_s14 = inlined_call_operand.vmem [shape: f32[16,1], index: 14, kind: input, shape index: {}]   ;;  %s3821_s15 = inlined_call_operand.vmem [shape: f32[16,1], index: 15, kind: input, shape index: {}]   ;;  %s3822_s16 = inlined_call_operand.vmem [shape: bf16[64,16], index: 16, kind: input, shape index: {}]   ;;  %s3823_s17 = inlined_call_operand.vmem [shape: f32[64,1], index: 17, kind: input, shape index: {}]   ;;  %s3824_s18 = inlined_call_operand.vmem [shape: bf16[16,64], index: 18, kind: input, shape index: {}]   ;;  %s3825_s19 = inlined_call_operand.vmem [shape: f32[16,1], index: 19, kind: input, shape index: {}]   ;;  %s3826_s20 = inlined_call_operand.vmem [shape: f32[16,1], index: 20, kind: input, shape index: {}]   ;;  %s3827_s21 = inlined_call_operand.hbm [shape: f32[2,16,256], index: 21, kind: output, shape index: {}]  }
   0x1   :  { %3843 = sst [smem:[#allocation11_spill]] %s3806_s0 }
   0x2   :  { %3844 = sst [smem:[#allocation12_spill]] %s3807_s1 }
   0x3   :  { %3845 = sst [smem:[#allocation13_spill]] %s3808_s2 }
   0x4   :  { %3846 = sst [smem:[#allocation14_spill]] %s3809_s3 }
   0x5   :  { %3847 = sst [smem:[#allocation15_spill]] %s3810_s4 }
   0x6   :  { %3848 = sst [smem:[#allocation16_spill]] %s3811_s5 }
   0x7   :  { %3849 = sst [smem:[#allocation17_spill]] %s3812_s6 }
   0x8   :  { %3850 = sst [smem:[#allocation18_spill]] %s3813_s7 }
   0x9   :  { %3851 = sst [smem:[#allocation19_spill]] %s3814_s8 }
   0xa   :  { %3852 = sst [smem:[#allocation20_spill]] %s3827_s21 }
   0xb   :  { %26 = vsyncpa [#allocation3], 0 }
   0xc   :  { %28 = vsyncpa [#allocation3 + $0x1], 0  ;;  %s2803_s2 = smov 0   ;;  %s2805_s25 = smov 0  }
   0xd   :  { %s2807_s26 = smov 0   ;;  %s2809_s27 = smov 0  }
   0xe LB: > { %3853 = sst [smem:[#allocation5_spill]] %s2659_s2  ;;  %s2824_s3 = sadd.s32 4294967295, %s2671_s27   ;;  %s2671_s27 = sphi %s2809_s27, %s3878_s27   ;;  %s2667_s26 = sphi %s2807_s26, %s3880_s26   ;;  %s2663_s25 = sphi %s2805_s25, %s3882_s25   ;;  %s2659_s2 = sphi %s2803_s2, %s3881_s2  }
   0xf   : > { %3854 = sst [smem:[#allocation6_spill]] %s2667_s26  ;;  %s2387_s28 = sadd.s32 4294967294, %s2671_s27  }
  0x10   : > { %3855 = sst [smem:[#allocation7_spill]] %s2671_s27  ;;  %s2828_s29 = sadd.s32 1, %s2671_s27  }
  0x11   : > { %3856 = sst [smem:[#allocation8_spill]] %s2828_s29  ;;  %s487_s0 = sadd.s32 1, %s2667_s26 }
  0x12   : > { %s484_s4 = ssub.s32 %s2671_s27, %s2828_s29  ;;  %p497_p0 = scmp.ne.s32.totalorder %s2667_s26, %s2663_s25 }
  0x13   : > { %p485_p1 = scmp.eq.s32.totalorder %s484_s4, 0  ;;  %p498_p2 = scmp.eq.s32.totalorder %s2824_s3, 1 }
  0x14   : > { %p503_p3 = scmp.ne.s32.totalorder %s2663_s25, %s2659_s2  ;;  %p504_p4 = scmp.eq.s32.totalorder %s2387_s28, 1 }
  0x15   : > { %s2839_s30 = scalar_select %p485_p1, %s2667_s26, %s487_s0  }
  0x16   : > { %p2841_p5 = por %p498_p2, %p497_p0  ;;  %p2845_p6 = por %p504_p4, %p503_p3 }
  0x17   : > { %3857 = sst [smem:[#allocation9_spill]] %s2839_s30  ;;  %p2390_p7 = scmp.ge.s32.totalorder %s2671_s27, 1 }
  0x18   : > { %s3859_s22 = scalar_select %p2845_p6, 1, 0 }
  0x19   : > { %p590_p8 = scmp.lt.s32.totalorder %s2671_s27, 3 }
  0x1a   : > { %3860 = sst [smem:[#allocation10_spill]] %s3859_s22 }
  0x1b   : > { %p591_p9 = pnand %p2390_p7, %p590_p8 }
  0x1c   : > { %s3861_s24 = sld [smem:[#allocation12_spill]] (!%p591_p9)  ;;  %p650_p10 = scmp.lt.s32.totalorder (!%p591_p9), %s2824_s3, 1  ;;  %v2673_v1 = vmov (!%p591_p9), 0   ;;  %v2674_v2 = vmov (!%p591_p9), 4   ;;  %v2675_v4 = vmov (!%p591_p9), 1   ;;  %v2677_v9 = vmov (!%p591_p9), 2  }
  0x1d   : > { %594 = sbr.rel (%p591_p9) target bundleno = 2376 (0x948), region = 104  ;;  %2483 = vset.pattern.permute.xlu1 (!%p591_p9), %v2673_v1  ;;  %2482 = vset.pattern.permute.xlu0 (!%p591_p9), %v2674_v2  ;;  %s3862_s26 = sld [smem:[#allocation11_spill]] (!%p591_p9)  ;;  %v2679_v10 = vmov (!%p591_p9), 3   ;;  %v2681_v11 = vmov (!%p591_p9), 5   ;;  %v2683_v12 = vmov (!%p591_p9), 6   ;;  %v2685_v13 = vmov (!%p591_p9), 7  }
  0x1e   : > { %1216 = vmatprep.mubr.bf16.mxu0 (!%p591_p9), %v2673_v1  ;;  %1236 = vmatprep.mubr.bf16.mxu1 (!%p591_p9), %v2673_v1  ;;  %s2680_s30 = smov (!%p591_p9), 15   ;;  %s2682_s0 = smov (!%p591_p9), 1   ;;  %v2687_v14 = vmov (!%p591_p9), 8   ;;  %v688_v27 = vlaneseq (!%p591_p9)  ;;  %vm1174_vm8 = vcmask (!%p591_p9), 130048  }
  0x1f   : > { %s2684_s4 = smov (!%p591_p9), 127   ;;  %s2688_s1 = smov (!%p591_p9), 112  }
  0x20   : > { %s3864_s6 = sld [smem:[#allocation17_spill]] (!%p591_p9)  ;;  %s3865_s8 = sld [smem:[#allocation19_spill]] (!%p591_p9)  ;;  %v2969_v30 = vshrl.u32 (!%p591_p9), %v688_v27, 7  ;;  %v2971_v33 = vand.u32 (!%p591_p9), 127, %v688_v27 }
  0x21   : > { %s3867_s2 = sld [smem:[#allocation14_spill]] (!%p591_p9)  ;;  %s3871_s7 = sld [smem:[#allocation18_spill]] (!%p591_p9) }
  0x22   : > { %v2854_v0 = vld [vmem:[%s3861_s24] sm:$0xff] (!%p591_p9)  ;;  %v2864_v3 = vld [vmem:[%s3861_s24 + $0x8] sm:$0xff] (!%p591_p9)  ;;  %v697_v34 = vsub.s32 (!%p591_p9), 0, %v2969_v30  ;;  %vm690_vm0 = vcmp.lt.s32.totalorder (!%p591_p9), %v2971_v33, 17  ;;  %v738_v41 = vsub.s32 (!%p591_p9), 1, %v2969_v30  ;;  %vm731_vm1 = vcmp.lt.s32.totalorder (!%p591_p9), %v2971_v33, 16 }
  0x23   : > { %708 = vperm.xlu1 (!%p591_p9), %2483, %v2854_v0   ;;  %668 = vperm.xlu0 (!%p591_p9), %2482, %v2854_v0   ;;  %vm772_vm2 = vcmp.lt.s32.totalorder (!%p591_p9), %v2971_v33, 15  ;;  %vm813_vm3 = vcmp.lt.s32.totalorder (!%p591_p9), %v2971_v33, 1  ;;  %vm854_vm4 = vcmp.lt.s32.totalorder (!%p591_p9), %v2971_v33, 127  ;;  %vm895_vm5 = vcmp.lt.s32.totalorder (!%p591_p9), %v2971_v33, 113  ;;  %s647_s27 = sand.u32 (!%p591_p9), 1, %s2663_s25  }
  0x24   : > { %s651_s28 = scalar_select %p650_p10, %s2824_s3, 1  ;;  %vm936_vm6 = vcmp.lt.s32.totalorder %v2971_v33, 112  ;;  %vm977_vm7 = vcmp.lt.s32.totalorder %v2971_v33, 111 }
  0x26   : > { %s2420_s23 = sshll.u32 %s651_s28, 5  ;;  %s2676_s28 = smov 17   ;;  %v1036_v16 = vld [vmem:[%s3864_s6] sm:$0xff]  ;;  %v1125_v17 = vld [vmem:[%s3865_s8 + $0x10] sm:$0xff]  ;;  %v1037_v22 = vld [vmem:[%s3864_s6 + $0x8] sm:$0xff] }
  0x27   : > { %712 = vperm.xlu1 %2483, %v2864_v3   ;;  %673 = vperm.xlu0 %2482, %v2864_v3   ;;  %s2873_s29 = scalar_lea.vmem %s3862_s26, %s2420_s23  ;;  %s3836_s26 = smov 16   ;;  %v1123_v18 = vld [vmem:[%s3865_s8] sm:$0xff]  ;;  %v1126_v23 = vld [vmem:[%s3865_s8 + $0x18] sm:$0xff]  ;;  %v1124_v26 = vld [vmem:[%s3865_s8 + $0x8] sm:$0xff] }
  0x28   : > { %v2876_v5 = vld [vmem:[%s2873_s29 + $0x10] sm:$0xff]  ;;  %v2879_v6 = vld [vmem:[%s2873_s29] sm:$0xff]  ;;  %v2886_v7 = vld [vmem:[%s2873_s29 + $0x18] sm:$0xff]  ;;  %s2686_s23 = smov 113   ;;  %s3868_s22 = smov %s3867_s2 }
  0x29   : > { %v2889_v8 = vld [vmem:[%s2873_s29 + $0x8] sm:$0xff]  ;;  %v2977_v35 = vld [vmem:[%s3867_s2] sm:$0xff]  ;;  %s3869_s2 = sld [smem:[#allocation15_spill]] }
  0x2a   : > { %v2982_v36 = vld [vmem:[%s3868_s22 + $0x8] sm:$0xff]  ;;  %v698_v39 = vrot.slane %v2977_v35, %v697_v34  ;;  %v739_v62 = vrot.slane %v2977_v35, %v738_v41 }
  0x2b   : > { %2485 = vset.pattern.permute.xlu1 %v2675_v4  ;;  %2484 = vset.pattern.permute.xlu0 %v2675_v4  ;;  %v702_v40 = vrot.slane %v2982_v36, %v697_v34  ;;  %v743_v63 = vrot.slane %v2982_v36, %v738_v41 }
  0x2c   : > { %753 = vperm.xlu1 %2485, %v2864_v3   ;;  %749 = vperm.xlu0 %2484, %v2854_v0  }
  0x30   : > { %682 = vrot.lane.b32.xlu0 %v2876_v5, %s2676_s28  ;;  %680 = vrot.lane.b32.xlu1 %v2879_v6, %s2676_s28 }
  0x31   : > { %2486 = vset.pattern.permute.xlu1 %v2677_v9  ;;  %2487 = vset.pattern.permute.xlu0 %v2677_v9 }
  0x34   : > { %686 = vrot.lane.b32.xlu0 %v2886_v7, %s2676_s28  ;;  %684 = vrot.lane.b32.xlu1 %v2889_v8, %s2676_s28  ;;  %s2689_s28 = smov 111  }
  0x38   : > { %794 = vperm.xlu0 %2487, %v2864_v3   ;;  %790 = vperm.xlu1 %2486, %v2854_v0  }
  0x3c   : > { %727 = vrot.lane.b32.xlu0 %v2889_v8, %s3836_s26  ;;  %723 = vrot.lane.b32.xlu1 %v2879_v6, %s3836_s26 }
  0x3d   : > { %2488 = vset.pattern.permute.xlu0 %v2679_v10  ;;  %2489 = vset.pattern.permute.xlu1 %v2679_v10 }
  0x40   : > { %831 = vperm.xlu0 %2488, %v2854_v0   ;;  %725 = vrot.lane.b32.xlu1 %v2876_v5, %s3836_s26 }
  0x44   : > { %729 = vrot.lane.b32.xlu1 %v2886_v7, %s3836_s26  ;;  %766 = vrot.lane.b32.xlu0 %v2876_v5, %s2680_s30  ;;  %s3872_s26 = sld [smem:[#allocation20_spill]] }
  0x45   : > { %2491 = vset.pattern.permute.xlu0 %v2681_v11 }
  0x48   : > { %835 = vperm.xlu1 %2489, %v2864_v3   ;;  %770 = vrot.lane.b32.xlu0 %v2886_v7, %s2680_s30 }
  0x4c   : > { %764 = vrot.lane.b32.xlu1 %v2879_v6, %s2680_s30  ;;  %876 = vperm.xlu0 %2491, %v2864_v3  }
  0x4d   : > { %2490 = vset.pattern.permute.xlu1 %v2681_v11 }
  0x50   : > { %768 = vrot.lane.b32.xlu1 %v2889_v8, %s2680_s30  ;;  %809 = vrot.lane.b32.xlu0 %v2889_v8, %s2682_s0  ;;  %s3870_s30 = smov %s3869_s2 }
  0x51   : > { %2492 = vset.pattern.permute.xlu0 %v2683_v12 }
  0x54   : > { %872 = vperm.xlu1 %2490, %v2854_v0   ;;  %913 = vperm.xlu0 %2492, %v2854_v0  }
  0x58   : > { %805 = vrot.lane.b32.xlu1 %v2879_v6, %s2682_s0  ;;  %848 = vrot.lane.b32.xlu0 %v2876_v5, %s2684_s4 }
  0x59   : > { %2493 = vset.pattern.permute.xlu1 %v2683_v12  ;;  %2495 = vset.pattern.permute.xlu0 %v2685_v13 }
  0x5c   : > { %807 = vrot.lane.b32.xlu1 %v2876_v5, %s2682_s0  ;;  %852 = vrot.lane.b32.xlu0 %v2886_v7, %s2684_s4 }
  0x60   : > { %811 = vrot.lane.b32.xlu1 %v2886_v7, %s2682_s0  ;;  %958 = vperm.xlu0 %2495, %v2864_v3   ;;  %s2421_s0 = sshll.u32 %s2824_s3, 9  ;;  %s3764_s3 = scalar_lea.sflag [#allocation3], %s647_s27 }
  0x61   : > { %s3760_s21 = scalar_lea.hbm %s3872_s26, %s2421_s0 }
  0x64   : > { %917 = vperm.xlu1 %2493, %v2864_v3   ;;  %891 = vrot.lane.b32.xlu0 %v2889_v8, %s2686_s23 }
  0x65   : > { %2496 = vset.pattern.permute.xlu0 %v2687_v14 }
  0x68   : > { %846 = vrot.lane.b32.xlu1 %v2879_v6, %s2684_s4  ;;  %995 = vperm.xlu0 %2496, %v2854_v0  }
  0x69   : > { %2494 = vset.pattern.permute.xlu1 %v2685_v13 }
  0x6c   : > { %850 = vrot.lane.b32.xlu1 %v2889_v8, %s2684_s4  ;;  %930 = vrot.lane.b32.xlu0 %v2876_v5, %s2688_s1  ;;  %s3863_s4 = sld [smem:[#allocation13_spill]] }
  0x6d   : > { %2499 = vset.pattern.permute.xlu0 %v2673_v1 }
  0x70   : > { %954 = vperm.xlu1 %2494, %v2854_v0   ;;  %934 = vrot.lane.b32.xlu0 %v2886_v7, %s2688_s1 }
  0x72   : > { %v1011_v15 = vld [vmem:[%s3863_s4 + $0x8] sm:$0xff]  ;;  %v1010_v19 = vld [vmem:[%s3863_s4] sm:$0xff]  ;;  %s3873_s4 = smov %s3872_s26 }
  0x74   : > { %887 = vrot.lane.b32.xlu1 %v2879_v6, %s2686_s23  ;;  %971 = vrot.lane.b32.xlu0 %v2876_v5, %s2689_s28 }
  0x75   : > { %2497 = vset.pattern.permute.xlu1 %v2687_v14 }
  0x78   : > { %889 = vrot.lane.b32.xlu1 %v2876_v5, %s2686_s23  ;;  %975 = vrot.lane.b32.xlu0 %v2886_v7, %s2689_s28 }
  0x7c   : > { %893 = vrot.lane.b32.xlu1 %v2886_v7, %s2686_s23  ;;  %1019 = vperm.xlu0 %2499, %v1011_v15   ;;  %s3866_s23 = sld [smem:[#allocation16_spill]] }
  0x80   : > { %999 = vperm.xlu1 %2497, %v2864_v3   ;;  %1103 = vperm.xlu0 %2499, %v1036_v16  }
  0x82   : > { %v1034_v20 = vld [vmem:[%s3866_s23] sm:$0xff]  ;;  %v1035_v21 = vld [vmem:[%s3866_s23 + $0x8] sm:$0xff] }
  0x84   : > { %928 = vrot.lane.b32.xlu1 %v2879_v6, %s2688_s1  ;;  %1141 = vperm.xlu0 %2499, %v1125_v17  }
  0x85   : > { %2498 = vset.pattern.permute.xlu1 %v2673_v1 }
  0x88   : > { %932 = vrot.lane.b32.xlu1 %v2889_v8, %s2688_s1  ;;  %1131 = vperm.xlu0 %2499, %v1123_v18  }
  0x8c   : > { %969 = vrot.lane.b32.xlu1 %v2879_v6, %s2689_s28 }
  0x90   : > { %973 = vrot.lane.b32.xlu1 %v2889_v8, %s2689_s28 }
  0x94   : > { %1014 = vperm.xlu1 %2498, %v1010_v19  }
  0x98   : > { %1089 = vperm.xlu1 %2498, %v1034_v20  }
  0x9c   : > { %1094 = vperm.xlu1 %2498, %v1035_v21  }
  0xa0   : > { %1108 = vperm.xlu1 %2498, %v1037_v22  }
  0xa2   : > { %v709_v24 = vpop.permute.xlu1 %708  ;;  %v669_v25 = vpop.permute.xlu0 %668 }
  0xa3   : > { %v676_v42 = vmul.f32 %v669_v25, %v2879_v6  ;;  %v677_v43 = vmul.f32 %v669_v25, %v2889_v8 }
  0xa4   : > { %1146 = vperm.xlu1 %2498, %v1126_v23  }
  0xa6   : > { %v713_v28 = vpop.permute.xlu1 %712  ;;  %v674_v29 = vpop.permute.xlu0 %673 }
  0xa7   : > { %v678_v44 = vmul.f32 %v674_v29, %v2876_v5  ;;  %v679_v45 = vmul.f32 %v674_v29, %v2886_v7  ;;  %v779_v29 = vsub.s32 2, %v2969_v30 }
  0xa8   : > { %1136 = vperm.xlu1 %2498, %v1124_v26  }
  0xab   : > { %v754_v31 = vpop.permute.xlu1 %753  ;;  %v750_v32 = vpop.permute.xlu0 %749 }
  0xaf   : > { %v683_v37 = vpop.permute.xlu0 %682  ;;  %v681_v38 = vpop.permute.xlu1 %680 }
  0xb3   : > { %v687_v46 = vpop.permute.xlu0 %686  ;;  %v685_v47 = vpop.permute.xlu1 %684 }
  0xb4   : > { %v692_v48 = vsel %vm690_vm0, %v683_v37, %v687_v46  ;;  %v694_v49 = vsel %vm690_vm0, %v687_v46, %v683_v37  ;;  %v691_v50 = vsel %vm690_vm0, %v681_v38, %v685_v47  ;;  %v693_v51 = vsel %vm690_vm0, %v685_v47, %v681_v38 }
  0xb5   : > { %v705_v52 = vmul.f32 %v698_v39, %v694_v49  ;;  %v706_v53 = vmul.f32 %v702_v40, %v692_v48  ;;  %v703_v54 = vmul.f32 %v698_v39, %v693_v51  ;;  %v704_v55 = vmul.f32 %v702_v40, %v691_v50 }
  0xb6   : > { %v780_v37 = vrot.slane %v2977_v35, %v779_v29  ;;  %v784_v38 = vrot.slane %v2982_v36, %v779_v29 }
  0xb7   : > { %v717_v56 = vmul.f32 %v713_v28, %v705_v52  ;;  %v718_v57 = vmul.f32 %v713_v28, %v706_v53  ;;  %v715_v58 = vmul.f32 %v709_v24, %v703_v54  ;;  %v716_v59 = vmul.f32 %v709_v24, %v704_v55  ;;  %v795_v60 = vpop.permute.xlu0 %794  ;;  %v791_v61 = vpop.permute.xlu1 %790 }
  0xb9   : > { %v721_v0 = vadd.f32 %v717_v56, %v678_v44  ;;  %v722_v2 = vadd.f32 %v718_v57, %v679_v45  ;;  %v719_v3 = vadd.f32 %v715_v58, %v676_v42  ;;  %v720_v4 = vadd.f32 %v716_v59, %v677_v43 }
  0xba   : > { %v820_v56 = vsub.s32 3, %v2969_v30 }
  0xbb   : > { %v728_v5 = vpop.permute.xlu0 %727  ;;  %v724_v6 = vpop.permute.xlu1 %723 }
  0xbc   : > { %v732_v7 = vsel %vm731_vm1, %v724_v6, %v728_v5  ;;  %v734_v8 = vsel %vm731_vm1, %v728_v5, %v724_v6 }
  0xbd   : > { %v744_v9 = vmul.f32 %v739_v62, %v734_v8  ;;  %v745_v10 = vmul.f32 %v743_v63, %v732_v7 }
  0xbf   : > { %v756_v11 = vmul.f32 %v750_v32, %v744_v9  ;;  %v757_v12 = vmul.f32 %v750_v32, %v745_v10  ;;  %v2999_v13 = vpop.permute.xlu0 %831  ;;  %v726_v14 = vpop.permute.xlu1 %725 }
  0xc1   : > { %v760_v15 = vadd.f32 %v756_v11, %v719_v3  ;;  %v761_v16 = vadd.f32 %v757_v12, %v720_v4 }
  0xc3   : > { %v767_v17 = vpop.permute.xlu0 %766  ;;  %v730_v18 = vpop.permute.xlu1 %729 }
  0xc4   : > { %v733_v19 = vsel %vm731_vm1, %v726_v14, %v730_v18  ;;  %v735_v20 = vsel %vm731_vm1, %v730_v18, %v726_v14 }
  0xc5   : > { %v746_v21 = vmul.f32 %v739_v62, %v735_v20  ;;  %v747_v22 = vmul.f32 %v743_v63, %v733_v19  ;;  %v821_v62 = vrot.slane %v2977_v35, %v820_v56  ;;  %v825_v63 = vrot.slane %v2982_v36, %v820_v56 }
  0xc7   : > { %v758_v23 = vmul.f32 %v754_v31, %v746_v21  ;;  %v759_v24 = vmul.f32 %v754_v31, %v747_v22  ;;  %v771_v25 = vpop.permute.xlu0 %770  ;;  %v836_v26 = vpop.permute.xlu1 %835  ;;  %v861_v21 = vsub.s32 5, %v2969_v30 }
  0xc8   : > { %v774_v52 = vsel %vm772_vm2, %v767_v17, %v771_v25  ;;  %v776_v53 = vsel %vm772_vm2, %v771_v25, %v767_v17 }
  0xc9   : > { %v762_v27 = vadd.f32 %v758_v23, %v721_v0  ;;  %v763_v28 = vadd.f32 %v759_v24, %v722_v2  ;;  %v787_v54 = vmul.f32 %v780_v37, %v776_v53  ;;  %v788_v55 = vmul.f32 %v784_v38, %v774_v52 }
  0xca   : > { %v862_v24 = vrot.slane %v2977_v35, %v861_v21  ;;  %v866_v25 = vrot.slane %v2982_v36, %v861_v21 }
  0xcb   : > { %v765_v32 = vpop.permute.xlu1 %764  ;;  %v3006_v34 = vpop.permute.xlu0 %876  ;;  %v799_v59 = vmul.f32 %v795_v60, %v787_v54 }
  0xcd   : > { %v803_v7 = vadd.f32 %v799_v59, %v762_v27 }
  0xcf   : > { %v769_v39 = vpop.permute.xlu1 %768  ;;  %v810_v40 = vpop.permute.xlu0 %809 }
  0xd0   : > { %v773_v31 = vsel %vm772_vm2, %v765_v32, %v769_v39  ;;  %v775_v41 = vsel %vm772_vm2, %v769_v39, %v765_v32 }
  0xd1   : > { %v785_v42 = vmul.f32 %v780_v37, %v775_v41  ;;  %v786_v43 = vmul.f32 %v784_v38, %v773_v31  ;;  %v943_v38 = vsub.s32 7, %v2969_v30 }
  0xd3   : > { %v797_v44 = vmul.f32 %v791_v61, %v785_v42  ;;  %v798_v45 = vmul.f32 %v791_v61, %v786_v43  ;;  %v3015_v46 = vpop.permute.xlu1 %872  ;;  %v3017_v47 = vpop.permute.xlu0 %913  ;;  %v800_v61 = vmul.f32 %v795_v60, %v788_v55  ;;  %v944_v55 = vrot.slane %v2977_v35, %v943_v38 }
  0xd4   : > { %v948_v56 = vrot.slane %v2982_v36, %v943_v38 }
  0xd5   : > { %v3019_v48 = vadd.f32 %v797_v44, %v760_v15  ;;  %v3021_v49 = vadd.f32 %v798_v45, %v761_v16  ;;  %v804_v8 = vadd.f32 %v800_v61, %v763_v28  ;;  %v902_v28 = vsub.s32 6, %v2969_v30 }
  0xd7   : > { %v806_v50 = vpop.permute.xlu1 %805  ;;  %v849_v51 = vpop.permute.xlu0 %848  ;;  %v903_v43 = vrot.slane %v2977_v35, %v902_v28  ;;  %v907_v44 = vrot.slane %v2982_v36, %v902_v28 }
  0xd8   : > { %v814_v32 = vsel %vm813_vm3, %v806_v50, %v810_v40  ;;  %v816_v37 = vsel %vm813_vm3, %v810_v40, %v806_v50 }
  0xd9   : > { %v826_v40 = vmul.f32 %v821_v62, %v816_v37  ;;  %v827_v50 = vmul.f32 %v825_v63, %v814_v32 }
  0xdb   : > { %v808_v57 = vpop.permute.xlu1 %807  ;;  %v853_v58 = vpop.permute.xlu0 %852  ;;  %v838_v36 = vmul.f32 %v2999_v13, %v826_v40 }
  0xdc   : > { %v858_v27 = vsel %vm854_vm4, %v853_v58, %v849_v51 }
  0xdd   : > { %v870_v31 = vmul.f32 %v866_v25, %v858_v27  ;;  %v842_v38 = vadd.f32 %v838_v36, %v3019_v48  ;;  %v1029_v36 = vld [vmem:[%s3870_s30 + $0x18] sm:$0xff] }
  0xdf   : > { %v812_v0 = vpop.permute.xlu1 %811  ;;  %v3035_v6 = vpop.permute.xlu0 %958  ;;  %v882_v54 = vmul.f32 %v3006_v34, %v870_v31 }
  0xe0   : > { %v815_v2 = vsel %vm813_vm3, %v808_v57, %v812_v0  ;;  %v817_v3 = vsel %vm813_vm3, %v812_v0, %v808_v57 }
  0xe1   : > { %v828_v4 = vmul.f32 %v821_v62, %v817_v3  ;;  %v829_v5 = vmul.f32 %v825_v63, %v815_v2  ;;  %v839_v63 = vmul.f32 %v2999_v13, %v827_v50  ;;  %v2395_v13 = vld [vmem:[%s3868_s22 + $0x18] ss:$0 sm:$0xff] }
  0xe3   : > { %v840_v9 = vmul.f32 %v836_v26, %v828_v4  ;;  %v841_v10 = vmul.f32 %v836_v26, %v829_v5  ;;  %v918_v60 = vpop.permute.xlu1 %917  ;;  %v892_v15 = vpop.permute.xlu0 %891  ;;  %v856_v26 = vsel %vm854_vm4, %v849_v51, %v853_v58 }
  0xe4   : > { %v869_v39 = vmul.f32 %v862_v24, %v856_v26 }
  0xe5   : > { %v844_v11 = vadd.f32 %v840_v9, %v803_v7  ;;  %v845_v12 = vadd.f32 %v841_v10, %v804_v8 }
  0xe6   : > { %v881_v53 = vmul.f32 %v3006_v34, %v869_v39  ;;  %v843_v39 = vadd.f32 %v839_v63, %v3021_v49  ;;  %v1026_v63 = vld [vmem:[%s3870_s30] sm:$0xff] }
  0xe7   : > { %v847_v14 = vpop.permute.xlu1 %846  ;;  %v3037_v17 = vpop.permute.xlu0 %995  ;;  %v886_v10 = vadd.f32 %v882_v54, %v845_v12 }
  0xe8   : > { %v885_v9 = vadd.f32 %v881_v53, %v844_v11 }
  0xeb   : > { %v851_v16 = vpop.permute.xlu1 %850  ;;  %v931_v19 = vpop.permute.xlu0 %930 }
  0xec   : > { %v855_v57 = vsel %vm854_vm4, %v847_v14, %v851_v16  ;;  %v857_v58 = vsel %vm854_vm4, %v851_v16, %v847_v14 }
  0xed   : > { %v867_v4 = vmul.f32 %v862_v24, %v855_v57  ;;  %v868_v5 = vmul.f32 %v866_v25, %v857_v58 }
  0xef   : > { %v3039_v18 = vpop.permute.xlu1 %954  ;;  %v935_v23 = vpop.permute.xlu0 %934  ;;  %v880_v24 = vmul.f32 %v3015_v46, %v868_v5 }
  0xf0   : > { %v938_v59 = vsel %vm936_vm6, %v931_v19, %v935_v23  ;;  %v940_v61 = vsel %vm936_vm6, %v935_v23, %v931_v19  ;;  %v879_v23 = vmul.f32 %v3015_v46, %v867_v4 }
  0xf1   : > { %v951_v7 = vmul.f32 %v944_v55, %v938_v59  ;;  %v952_v8 = vmul.f32 %v948_v56, %v940_v61  ;;  %v1028_v61 = vld [vmem:[%s3869_s2 + $0x10] sm:$0xff]  ;;  %s2391_s2 = sshll.u32 %s647_s27, 5 }
  0xf2   : > { %v883_v46 = vadd.f32 %v879_v23, %v842_v38  ;;  %s649_s6 = scalar_lea.vmem [#allocation2], %s2391_s2 }
  0xf3   : > { %v888_v20 = vpop.permute.xlu1 %887  ;;  %v972_v45 = vpop.permute.xlu0 %971  ;;  %v963_v25 = vmul.f32 %v3035_v6, %v951_v7  ;;  %v964_v26 = vmul.f32 %v3035_v6, %v952_v8  ;;  %s2325_s1 = sshll.u32 %s649_s6, 4  ;;  %s3753_s1 = int_to_ptr.vmem [resolvable:$true] %s2325_s1 }
  0xf4   : > { %v896_v34 = vsel %vm895_vm5, %v888_v20, %v892_v15  ;;  %v898_v35 = vsel %vm895_vm5, %v892_v15, %v888_v20  ;;  %v2394_v15 = vld [vmem:[%s3868_s22 + $0x10] ss:$0 sm:$0xff]  ;;  %s2609_s2 = scalar_lea.vmem %s3753_s1, 512 }
  0xf5   : > { %v908_v14 = vmul.f32 %v903_v43, %v896_v34  ;;  %v909_v16 = vmul.f32 %v907_v44, %v898_v35  ;;  %p2610_p11 = scmp.ne.s32.totalorder %s3753_s1, %s2609_s2 }
  0xf7   : > { %v890_v22 = vpop.permute.xlu1 %889  ;;  %v976_v3 = vpop.permute.xlu0 %975  ;;  %v920_v31 = vmul.f32 %v3017_v47, %v908_v14  ;;  %p2611_p12 = pnand %p2610_p11, %p2841_p5 }
  0xf8   : > { %v981_v20 = vsel %vm977_vm7, %v976_v3, %v972_v45 }
  0xf9   : > { %v993_v28 = vmul.f32 %v2395_v13, %v981_v20  ;;  %p2612_p13 = pneg %p2611_p12 }
  0xfb   : > { %v894_v29 = vpop.permute.xlu1 %893  ;;  %v1020_v57 = vpop.permute.xlu0 %1019 }
  0xfc   : > { %v897_v41 = vsel %vm895_vm5, %v890_v22, %v894_v29  ;;  %v899_v42 = vsel %vm895_vm5, %v894_v29, %v890_v22 }
  0xfd   : > { %v910_v52 = vmul.f32 %v903_v43, %v897_v41  ;;  %v911_v30 = vmul.f32 %v907_v44, %v899_v42  ;;  %v921_v41 = vmul.f32 %v3017_v47, %v909_v16  ;;  %v884_v44 = vadd.f32 %v880_v24, %v843_v39 }
  0xff   : > { %v1000_v51 = vpop.permute.xlu1 %999  ;;  %v922_v0 = vmul.f32 %v918_v60, %v910_v52  ;;  %v923_v2 = vmul.f32 %v918_v60, %v911_v30  ;;  %v979_v60 = vsel %vm977_vm7, %v972_v45, %v976_v3  ;;  %v924_v30 = vadd.f32 %v920_v31, %v883_v46 }
 0x100   : > { %v992_v27 = vmul.f32 %v2394_v15, %v979_v60  ;;  %v1005_v40 = vmul.f32 %v1000_v51, %v993_v28  ;;  %v925_v53 = vadd.f32 %v921_v41, %v884_v44 }
 0x101   : > { %v926_v21 = vadd.f32 %v922_v0, %v885_v9  ;;  %v927_v22 = vadd.f32 %v923_v2, %v886_v10 }
 0x102   : > { %v1004_v45 = vmul.f32 %v1000_v51, %v992_v27 }
 0x103   : > { %v929_v62 = vpop.permute.xlu1 %928  ;;  %v967_v42 = vadd.f32 %v963_v25, %v926_v21  ;;  %v968_v43 = vadd.f32 %v964_v26, %v927_v22 }
 0x105   : > { %v1008_v47 = vadd.f32 %v1004_v45, %v967_v42  ;;  %v1009_v54 = vadd.f32 %v1005_v40, %v968_v43 }
 0x107   : > { %v933_v19 = vpop.permute.xlu1 %932  ;;  %v1025_v34 = vadd.f32 %v1020_v57, %v1009_v54 }
 0x108   : > { %v937_v11 = vsel %vm936_vm6, %v929_v62, %v933_v19  ;;  %v939_v12 = vsel %vm936_vm6, %v933_v19, %v929_v62  ;;  %v1024_v62 = vadd.f32 %v1020_v57, %v1008_v47 }
 0x109   : > { %v949_v29 = vmul.f32 %v944_v55, %v937_v11  ;;  %v950_v32 = vmul.f32 %v948_v56, %v939_v12  ;;  %v3126_v5 = vadd.f32 %v1029_v36, %v1025_v34 }
 0x10a   : > { %v3124_v4 = vadd.f32 %v1028_v61, %v1024_v62 }
 0x10b   : > { %v970_v37 = vpop.permute.xlu1 %969  ;;  %v961_v6 = vmul.f32 %v3039_v18, %v949_v29  ;;  %v962_v50 = vmul.f32 %v3039_v18, %v950_v32 }
 0x10d   : > { %v966_v59 = vadd.f32 %v962_v50, %v925_v53  ;;  %v965_v18 = vadd.f32 %v961_v6, %v924_v30 }
 0x10f   : > { %v974_v52 = vpop.permute.xlu1 %973 }
 0x110   : > { %v978_v48 = vsel %vm977_vm7, %v970_v37, %v974_v52  ;;  %v980_v49 = vsel %vm977_vm7, %v974_v52, %v970_v37 }
 0x111   : > { %v990_v55 = vmul.f32 %v2394_v15, %v978_v48  ;;  %v991_v56 = vmul.f32 %v2395_v13, %v980_v49 }
 0x113   : > { %v1002_v51 = vmul.f32 %v3037_v17, %v990_v55  ;;  %v1003_v58 = vmul.f32 %v3037_v17, %v991_v56  ;;  %v1027_v17 = vld [vmem:[%s3870_s30 + $0x8] sm:$0xff]  ;;  %v1015_v0 = vpop.permute.xlu1 %1014 }
 0x115   : > { %v1007_v35 = vadd.f32 %v1003_v58, %v966_v59  ;;  %v1006_v33 = vadd.f32 %v1002_v51, %v965_v18 }
 0x117   : > { %v1022_v2 = vadd.f32 %v1015_v0, %v1006_v33  ;;  %v1023_v3 = vadd.f32 %v1015_v0, %v1007_v35  ;;  %v1090_v56 = vpop.permute.xlu1 %1089  ;;  %v1104_v33 = vpop.permute.xlu0 %1103 }
 0x119   : > { %v3128_v7 = vadd.f32 %v1026_v63, %v1022_v2  ;;  %v3130_v8 = vadd.f32 %v1027_v17, %v1023_v3 }
 0x11b   : > { %v1038_v9 = vadd.f32 %v3124_v4, %v3128_v7  ;;  %v1045_v10 = vadd.f32 %v3126_v5, %v3130_v8  ;;  %v1095_v57 = vpop.permute.xlu1 %1094 }
 0x11d   : > { %v1039_v14 = vrot.slane %v1038_v9, 4  ;;  %v1046_v16 = vrot.slane %v1045_v10, 4 }
 0x11f   : > { %v1040_v19 = vadd.f32 %v1039_v14, %v1038_v9  ;;  %v1047_v15 = vadd.f32 %v1046_v16, %v1045_v10  ;;  %v1109_v17 = vpop.permute.xlu1 %1108  ;;  %v2500_v16 = vld [vmem:[%s3871_s7] sm:$0xff]  }
 0x121   : > { %v1041_v13 = vrot.slane %v1040_v19, 2  ;;  %v1048_v60 = vrot.slane %v1047_v15, 2 }
 0x123   : > { %v1042_v20 = vadd.f32 %v1041_v13, %v1040_v19  ;;  %v1049_v11 = vadd.f32 %v1048_v60, %v1047_v15  ;;  %v2501_v19 = vld [vmem:[%s3871_s7 + $0x8] sm:$0xff]   ;;  %v1142_v60 = vpop.permute.xlu0 %1141 }
 0x125   : > { %v1043_v12 = vrot.slane %v1042_v20, 1  ;;  %v1050_v21 = vrot.slane %v1049_v11, 1 }
 0x127   : > { %v1044_v22 = vadd.f32 %v1043_v12, %v1042_v20  ;;  %v1051_v23 = vadd.f32 %v1050_v21, %v1049_v11  ;;  %v1147_v12 = vpop.permute.xlu1 %1146  ;;  %v1132_v21 = vpop.permute.xlu0 %1131 }
 0x129   : > { %v1053_v24 = vmul.f32 0.0625, %v1044_v22  ;;  %v1054_v25 = vmul.f32 0.0625, %v1051_v23 }
 0x12b   : > { %v1057_v26 = vsub.f32 %v3124_v4, %v1053_v24  ;;  %v1058_v27 = vsub.f32 %v3126_v5, %v1054_v25  ;;  %v1056_v28 = vsub.f32 %v3130_v8, %v1054_v25  ;;  %v1055_v29 = vsub.f32 %v3128_v7, %v1053_v24 }
 0x12d   : > { %v1060_v32 = vmul.f32 %v1056_v28, %v1056_v28  ;;  %v1062_v37 = vmul.f32 %v1058_v27, %v1058_v27  ;;  %v1059_v38 = vmul.f32 %v1055_v29, %v1055_v29  ;;  %v1061_v39 = vmul.f32 %v1057_v26, %v1057_v26 }
 0x12f   : > { %v1070_v31 = vadd.f32 %v1062_v37, %v1060_v32  ;;  %v1063_v41 = vadd.f32 %v1061_v39, %v1059_v38  ;;  %v1137_v38 = vpop.permute.xlu1 %1136 }
 0x131   : > { %v1071_v42 = vrot.slane %v1070_v31, 4  ;;  %v1064_v43 = vrot.slane %v1063_v41, 4 }
 0x133   : > { %v1072_v46 = vadd.f32 %v1071_v42, %v1070_v31  ;;  %v1065_v44 = vadd.f32 %v1064_v43, %v1063_v41 }
 0x135   : > { %v1073_v45 = vrot.slane %v1072_v46, 2  ;;  %v1066_v40 = vrot.slane %v1065_v44, 2 }
 0x137   : > { %v1074_v6 = vadd.f32 %v1073_v45, %v1072_v46  ;;  %v1067_v50 = vadd.f32 %v1066_v40, %v1065_v44 }
 0x139   : > { %v1075_v52 = vrot.slane %v1074_v6, 1  ;;  %v1068_v30 = vrot.slane %v1067_v50, 1 }
 0x13b   : > { %v1076_v53 = vadd.f32 %v1075_v52, %v1074_v6  ;;  %v1069_v48 = vadd.f32 %v1068_v30, %v1067_v50 }
 0x13d   : > { %v1078_v49 = vmul.f32 0.0625, %v1076_v53  ;;  %v1077_v47 = vmul.f32 0.0625, %v1069_v48  ;;  %v1358_v48 = vld [vmem:[%s3815_s9] sm:$0xff] }
 0x13f   : > { %v1080_v54 = vadd.f32 1e-06, %v1078_v49  ;;  %v1079_v55 = vadd.f32 1e-06, %v1077_v47  ;;  %v1359_v49 = vld [vmem:[%s3815_s9 + $0x8] sm:$0xff]  ;;  %v2502_v47 = vld [vmem:[%s3871_s7 + $0x10] sm:$0xff]  }
 0x140   : > { %s2691_s7 = smov [#allocation2]  }
 0x141   : > { %2509 = vrsqrt.f32 %v1080_v54 }
 0x142   : > { %2511 = vrsqrt.f32 %v1079_v55 }
 0x14b   : > { %v2510_v51 = vpop.eup %2509 }
 0x14c   : > { %v2512_v58 = vpop.eup %2511  ;;  %v1084_v59 = vmul.f32 %v2510_v51, %v1056_v28  ;;  %v1086_v18 = vmul.f32 %v2510_v51, %v1058_v27 }
 0x14d   : > { %v1083_v61 = vmul.f32 %v2512_v58, %v1055_v29  ;;  %v1085_v62 = vmul.f32 %v2512_v58, %v1057_v26 }
 0x14e   : > { %v1098_v34 = vmul.f32 %v1090_v56, %v1084_v59  ;;  %v1100_v35 = vmul.f32 %v1095_v57, %v1086_v18 }
 0x14f   : > { %v1097_v36 = vmul.f32 %v1090_v56, %v1083_v61  ;;  %v1099_v63 = vmul.f32 %v1095_v57, %v1085_v62 }
 0x150   : > { %v1114_v0 = vadd.f32 %v1109_v17, %v1100_v35  ;;  %v1112_v2 = vadd.f32 %v1104_v33, %v1098_v34 }
 0x151   : > { %v1113_v3 = vadd.f32 %v1109_v17, %v1099_v63  ;;  %v1111_v9 = vadd.f32 %v1104_v33, %v1097_v36 }
 0x152   : > { %v1122_v10 = vpack.c.bf16 %v1114_v0, %v1112_v2 }
 0x153   : > { %v1121_v14 = vpack.c.bf16 %v1113_v3, %v1111_v9 }
 0x154   : > { %1184 = vmatprep.subr.bf16.mxu0 %v1122_v10  ;;  %2422 = vmatprep.subr.bf16.mxu1 %v1122_v10 }
 0x155   : > { %1185 = vmatpush1.bf16.msra.mxu0 %v1121_v14  ;;  %2423 = vmatpush1.bf16.msra.mxu1 %v1121_v14 }
 0x158   : > { %2399 = vmatmul.mubr.msk.bf16.vlgmr.msra.gmra.mrb[0].mxu0 %vm1174_vm8, %v2500_v16  ;;  %2401 = vmatmul.mubr.msk.bf16.vlgmr.msra.gmra.mrb[0].mxu1 %vm1174_vm8, %v2502_v47 }
 0x159   : > { %1226 = vmatprep.mubr.bf16.mxu0 %v2673_v1 }
 0x160   : > { %2400 = vmatmul.mubr.msk.bf16.gmra.mrb[4].mxu0 %vm1174_vm8, %v2501_v19 }
 0x161   : > { %1740 = vmatprep.mubr.bf16.mxu0 %v2673_v1 }
 0x22b   : > { %v1218_v15 = vpop.f32.mrb[0].mxu0 }
 0x22c   : > { %v1220_v13 = vpop.f32.mrb[1].mxu0  ;;  %v3150_v23 = vadd.f32 %v1218_v15, %v1132_v21 }
 0x22d   : > { %v1222_v20 = vpop.f32.mrb[2].mxu0  ;;  %v3154_v26 = vadd.f32 %v1220_v13, %v1132_v21 }
 0x22e   : > { %v1224_v11 = vpop.f32.mrb[3].mxu0  ;;  %v1247_v41 = vmul.f32 %v3150_v23, %v3150_v23  ;;  %v3168_v42 = vadd.f32 %v1222_v20, %v1137_v38 }
 0x22f   : > { %v1248_v46 = vmul.f32 %v3154_v26, %v3154_v26  ;;  %v3174_v44 = vadd.f32 %v1224_v11, %v1137_v38 }
 0x230   : > { %v1249_v50 = vmul.f32 %v3168_v42, %v3168_v42 }
 0x231   : > { %v1250_v52 = vmul.f32 %v3174_v44, %v3174_v44  ;;  %v1251_v30 = vadd.f32 %v1248_v46, %v1247_v41 }
 0x233   : > { %v1228_v22 = vpop.f32.mrb[4].mxu0  ;;  %v1254_v53 = vadd.f32 %v1250_v52, %v1249_v50 }
 0x234   : > { %v3152_v24 = vadd.f32 %v1228_v22, %v1142_v60  ;;  %v1230_v25 = vpop.f32.mrb[5].mxu0 }
 0x235   : > { %v3156_v27 = vadd.f32 %v1230_v25, %v1142_v60  ;;  %v1232_v28 = vpop.f32.mrb[6].mxu0 }
 0x236   : > { %v1279_v29 = vmul.f32 %v3152_v24, %v3152_v24  ;;  %v3160_v32 = vadd.f32 %v1232_v28, %v1147_v12  ;;  %v1234_v37 = vpop.f32.mrb[7].mxu0 }
 0x237   : > { %v1280_v39 = vmul.f32 %v3156_v27, %v3156_v27  ;;  %v3164_v31 = vadd.f32 %v1234_v37, %v1147_v12 }
 0x238   : > { %v1281_v43 = vmul.f32 %v3160_v32, %v3160_v32 }
 0x239   : > { %v1282_v45 = vmul.f32 %v3164_v31, %v3164_v31  ;;  %v1283_v40 = vadd.f32 %v1280_v39, %v1279_v29 }
 0x23b   : > { %1284 = vadd.xlane.f32.xlu0 %v1283_v40  ;;  %v1286_v6 = vadd.f32 %v1282_v45, %v1281_v43 }
 0x23d   : > { %1287 = vadd.xlane.f32.xlu1 %v1286_v6 }
 0x23f   : > { %1252 = vadd.xlane.f32.xlu0 %v1251_v30 }
 0x243   : > { %1255 = vadd.xlane.f32.xlu0 %v1254_v53 }
 0x24e   : > { %1362 = vperm.xlu1 %2498, %v1358_v48  }
 0x259   : > { %1367 = vperm.xlu0 %2499, %v1359_v49  }
 0x2c8   : > { %v1285_v54 = vpop.xlane.xlu0 %1284 }
 0x2c9   : > { %2513 = vrsqrt.f32 %v1285_v54  ;;  %vm1291_vm9 = vcmp.eq.f32.partialorder %v1285_v54, inf  ;;  %v1294_v18 = vand.u32 2147483648, %v1285_v54  ;;  %vm1293_vm10 = vcmp.eq.f32.partialorder %v1285_v54, 0.0 }
 0x2ca   : > { %v1288_v55 = vpop.xlane.xlu1 %1287 }
 0x2cb   : > { %2515 = vrsqrt.f32 %v1288_v55  ;;  %vm1298_vm11 = vcmp.eq.f32.partialorder %v1288_v55, inf  ;;  %v1301_v33 = vand.u32 2147483648, %v1288_v55  ;;  %vm1300_vm12 = vcmp.eq.f32.partialorder %v1288_v55, 0.0 }
 0x2cc   : > { %v1253_v56 = vpop.xlane.xlu0 %1252 }
 0x2cd   : > { %2517 = vrsqrt.f32 %v1253_v56  ;;  %vm1259_vm13 = vcmp.eq.f32.partialorder %v1253_v56, inf  ;;  %v1262_v2 = vand.u32 2147483648, %v1253_v56  ;;  %vm1261_vm14 = vcmp.eq.f32.partialorder %v1253_v56, 0.0 }
 0x2ce   : > { %v1363_v50 = vpop.permute.xlu1 %1362 }
 0x2d0   : > { %v1256_v57 = vpop.xlane.xlu0 %1255 }
 0x2d1   : > { %2519 = vrsqrt.f32 %v1256_v57  ;;  %vm1266_vm15 = vcmp.eq.f32.partialorder %v1256_v57, inf  ;;  %v1269_v15 = vand.u32 2147483648, %v1256_v57  ;;  %vm1268_vm0 = vcmp.eq.f32.partialorder %v1256_v57, 0.0 }
 0x2d3   : > { %v2514_v51 = vpop.eup %2513 }
 0x2d4   : > { %v1290_v58 = vmul.f32 %v2514_v51, %v1285_v54 }
 0x2d5   : > { %v2516_v59 = vpop.eup %2515 }
 0x2d6   : > { %v1292_v61 = vsel %vm1291_vm9, %v1285_v54, %v1290_v58  ;;  %v1297_v62 = vmul.f32 %v2516_v59, %v1288_v55 }
 0x2d7   : > { %v2518_v34 = vpop.eup %2517  ;;  %v1295_v35 = vsel %vm1293_vm10, %v1294_v18, %v1292_v61 }
 0x2d8   : > { %v1303_v36 = vmax.f32 %v1295_v35, 1e-12  ;;  %v1299_v63 = vsel %vm1298_vm11, %v1288_v55, %v1297_v62  ;;  %v1258_v17 = vmul.f32 %v2518_v34, %v1253_v56  ;;  %v1368_v49 = vpop.permute.xlu0 %1367 }
 0x2d9   : > { %v1302_v0 = vsel %vm1300_vm12, %v1301_v33, %v1299_v63 }
 0x2da   : > { %2521 = vrcp.f32 %v1303_v36  ;;  %v1304_v3 = vmax.f32 %v1302_v0, 1e-12  ;;  %v1260_v9 = vsel %vm1259_vm13, %v1253_v56, %v1258_v17 }
 0x2db   : > { %v2520_v10 = vpop.eup %2519  ;;  %v1263_v14 = vsel %vm1261_vm14, %v1262_v2, %v1260_v9  ;;  %v1127_v9 = vld [vmem:[%s3865_s8 + $0x20] sm:$0xff] }
 0x2dc   : > { %2523 = vrcp.f32 %v1304_v3  ;;  %v1271_v16 = vmax.f32 %v1263_v14, 1e-12  ;;  %v1265_v19 = vmul.f32 %v2520_v10, %v1256_v57  ;;  %v1455_v10 = vld [vmem:[%s3818_s12] sm:$0xff]  ;;  %v1128_v14 = vld [vmem:[%s3865_s8 + $0x28] sm:$0xff]  ;;  %s2613_s8 = sshll.u32 %s2691_s7, 4  ;;  %s2614_s8 = int_to_ptr.vmem [resolvable:$false] %s2613_s8 }
 0x2dd   : > { %p2616_p0 = scmp.lt.s32.totalorder %s3753_s1, %s2614_s8 }
 0x2de   : > { %v1267_v13 = vsel %vm1266_vm15, %v1256_v57, %v1265_v19  ;;  %2525 = vrcp.f32 %v1271_v16  ;;  %v1456_v16 = vld [vmem:[%s3818_s12 + $0x8] sm:$0xff]  ;;  %v1518_v19 = vld [vmem:[%s3819_s13] sm:$0xff] }
 0x2df   : > { %v1270_v60 = vsel %vm1268_vm0, %v1269_v15, %v1267_v13  ;;  %v1519_v15 = vld [vmem:[%s3819_s13 + $0x8] sm:$0xff]  ;;  %v1538_v13 = vld [vmem:[%s3820_s14] sm:$0xff] }
 0x2e0   : > { %v1272_v20 = vmax.f32 %v1270_v60, 1e-12  ;;  %v1539_v60 = vld [vmem:[%s3820_s14 + $0x8] sm:$0xff] }
 0x2e2   : > { %2527 = vrcp.f32 %v1272_v20  ;;  %v1540_v20 = vld [vmem:[%s3821_s15] sm:$0xff] }
 0x2e4   : > { %v2522_v11 = vpop.eup %2521 }
 0x2e5   : > { %v1307_v21 = vmul.f32 %v2522_v11, %v3156_v27  ;;  %v1306_v25 = vmul.f32 %v2522_v11, %v3152_v24  ;;  %v3201_v24 = vpop.f32.mrb[0].mxu1  ;;  %v1541_v11 = vld [vmem:[%s3821_s15 + $0x8] sm:$0xff] }
 0x2e6   : > { %v2524_v12 = vpop.eup %2523 }
 0x2e7   : > { %v1310_v22 = vmul.f32 %v2524_v12, %v3164_v31  ;;  %v1309_v28 = vmul.f32 %v2524_v12, %v3160_v32  ;;  %v3203_v32 = vpop.f32.mrb[1].mxu1  ;;  %v1628_v12 = vld [vmem:[%s3823_s17] sm:$0xff] }
 0x2e8   : > { %v2526_v38 = vpop.eup %2525  ;;  %v3205_v40 = vpop.f32.mrb[2].mxu1 }
 0x2e9   : > { %v1314_v29 = vpack.c.bf16 %v1310_v22, %v1307_v21  ;;  %v1313_v37 = vpack.c.bf16 %v1309_v28, %v1306_v25  ;;  %v1275_v41 = vmul.f32 %v2526_v38, %v3154_v26  ;;  %v1274_v27 = vmul.f32 %v2526_v38, %v3150_v23  ;;  %v3207_v6 = vpop.f32.mrb[3].mxu1  ;;  %v1356_v26 = vld [vmem:[%s3816_s10] sm:$0xff]  ;;  %v1357_v23 = vld [vmem:[%s3816_s10 + $0x8] sm:$0xff]  ;;  %v1630_v22 = vld [vmem:[%s3823_s17 + $0x10] sm:$0xff] }
 0x2ea   : > { %v1629_v21 = vld [vmem:[%s3823_s17 + $0x8] sm:$0xff]  ;;  %v1631_v25 = vld [vmem:[%s3823_s17 + $0x18] sm:$0xff]  ;;  %v1632_v28 = vld [vmem:[%s3823_s17 + $0x20] sm:$0xff] }
 0x2eb   : > { %1315 = vmatprep.subr.bf16.mxu1 %v1314_v29  ;;  %v1633_v29 = vld [vmem:[%s3823_s17 + $0x28] sm:$0xff]  ;;  %v1635_v38 = vld [vmem:[%s3823_s17 + $0x38] sm:$0xff] }
 0x2ec   : > { %v2528_v39 = vpop.eup %2527  ;;  %1316 = vmatpush1.bf16.xpose.msra.mxu1 %v1313_v37  ;;  %v1634_v37 = vld [vmem:[%s3823_s17 + $0x30] sm:$0xff] }
 0x2ed   : > { %v1278_v43 = vmul.f32 %v2528_v39, %v3174_v44  ;;  %v1277_v46 = vmul.f32 %v2528_v39, %v3168_v42  ;;  %v1374_v42 = vsub.f32 1.0, %v1356_v26  ;;  %v1375_v44 = vsub.f32 1.0, %v1357_v23  ;;  %v2223_v39 = vld [vmem:[%s3825_s19] sm:$0xff] }
 0x2ef   : > { %v1312_v45 = vpack.c.bf16 %v1278_v43, %v1275_v41  ;;  %v1311_v31 = vpack.c.bf16 %v1277_v46, %v1274_v27  ;;  %v1376_v48 = vmul.f32 1e+30, %v1374_v42  ;;  %v1377_v57 = vmul.f32 1e+30, %v1375_v44  ;;  %v2224_v41 = vld [vmem:[%s3825_s19 + $0x8] sm:$0xff]  ;;  %v2287_v43 = vld [vmem:[%s3826_s20] sm:$0xff] }
 0x2f0   : > { %v2288_v46 = vld [vmem:[%s3826_s20 + $0x8] sm:$0xff] }
 0x2f1   : > { %1347 = vmatprep.mubr.bf16.mxu1 %v1312_v45 }
 0x2f3   : > { %1348 = vmatmul.mubr.bf16.vlgmr.msra.gmra.mrb[4].mxu1 %v1311_v31 }
 0x2f4   : > { %1440 = vmatprep.mubr.bf16.mxu1 %v2673_v1 }
 0x3c6   : > { %v1349_v52 = vpop.f32.mrb[4].mxu1 }
 0x3c7   : > { %v1370_v30 = vmul.f32 %v1363_v50, %v1349_v52  ;;  %v1351_v53 = vpop.f32.mrb[5].mxu1 }
 0x3c8   : > { %v1352_v47 = vpop.f32.mrb[6].mxu1 }
 0x3c9   : > { %v1372_v54 = vmul.f32 %v1370_v30, %v1356_v26  ;;  %v1371_v55 = vmul.f32 %v1368_v49, %v1352_v47  ;;  %v1354_v56 = vpop.f32.mrb[7].mxu1 }
 0x3cb   : > { %v1373_v51 = vmul.f32 %v1371_v55, %v1357_v23  ;;  %v1378_v58 = vsub.f32 %v1372_v54, %v1376_v48 }
 0x3cd   : > { %v1380_v59 = vsel %vm1174_vm8, %v1378_v58, -inf  ;;  %v1379_v18 = vsub.f32 %v1373_v51, %v1377_v57  ;;  %v2503_v57 = vld [vmem:[%s3817_s11] sm:$0xff]  }
 0x3ce   : > { %1381 = vmax.xlane.f32.xlu1 %v1380_v59 }
 0x3cf   : > { %v1383_v61 = vsel %vm1174_vm8, %v1379_v18, -inf }
 0x3d0   : > { %1384 = vmax.xlane.f32.xlu0 %v1383_v61 }
 0x45b   : > { %v1382_v62 = vpop.xlane.xlu1 %1381 }
 0x45c   : > { %v1386_v34 = vsub.f32 %v1378_v58, %v1382_v62 }
 0x45d   : > { %v1385_v35 = vpop.xlane.xlu0 %1384 }
 0x45e   : > { %v1388_v33 = vmul.f32 1.442695, %v1386_v34  ;;  %v1387_v36 = vsub.f32 %v1379_v18, %v1385_v35 }
 0x460   : > { %2529 = vpow2.f32 %v1388_v33  ;;  %v1390_v63 = vmul.f32 1.442695, %v1387_v36 }
 0x462   : > { %2531 = vpow2.f32 %v1390_v63 }
 0x46a   : > { %v3217_v17 = vpop.eup %2529 }
 0x46b   : > { %v1392_v0 = vsel %vm1174_vm8, %v3217_v17, 0.0 }
 0x46c   : > { %v3221_v2 = vpop.eup %2531  ;;  %1393 = vadd.xlane.f32.xlu1 %v1392_v0 }
 0x46d   : > { %v1395_v3 = vsel %vm1174_vm8, %v3221_v2, 0.0 }
 0x46e   : > { %1396 = vadd.xlane.f32.xlu0 %v1395_v3 }
 0x47d   : > { %1151 = vperm.xlu1 %2498, %v1127_v9  }
 0x481   : > { %1459 = vperm.xlu1 %2498, %v1455_v10  }
 0x484   : > { %1156 = vperm.xlu0 %2499, %v1128_v14  }
 0x485   : > { %1464 = vperm.xlu1 %2498, %v1456_v16  }
 0x488   : > { %1522 = vperm.xlu0 %2499, %v1518_v19  }
 0x489   : > { %1527 = vperm.xlu1 %2498, %v1519_v15  }
 0x48c   : > { %1592 = vperm.xlu0 %2499, %v1538_v13  }
 0x48d   : > { %1597 = vperm.xlu1 %2498, %v1539_v60  }
 0x490   : > { %1606 = vperm.xlu0 %2499, %v1540_v20  }
 0x491   : > { %1611 = vperm.xlu1 %2498, %v1541_v11  }
 0x494   : > { %1638 = vperm.xlu0 %2499, %v1628_v12  }
 0x495   : > { %1643 = vperm.xlu1 %2498, %v1629_v21  }
 0x498   : > { %1648 = vperm.xlu0 %2499, %v1630_v22  }
 0x499   : > { %1653 = vperm.xlu1 %2498, %v1631_v25  }
 0x49c   : > { %1658 = vperm.xlu0 %2499, %v1632_v28  }
 0x49d   : > { %1663 = vperm.xlu1 %2498, %v1633_v29  }
 0x4a0   : > { %1668 = vperm.xlu0 %2499, %v1634_v37  }
 0x4a1   : > { %1673 = vperm.xlu1 %2498, %v1635_v38  }
 0x4a4   : > { %2227 = vperm.xlu0 %2499, %v2223_v39  }
 0x4a5   : > { %2232 = vperm.xlu1 %2498, %v2224_v41  }
 0x4a8   : > { %2291 = vperm.xlu0 %2499, %v2287_v43  }
 0x4a9   : > { %2296 = vperm.xlu1 %2498, %v2288_v46  }
 0x4f9   : > { %v1394_v45 = vpop.xlane.xlu1 %1393 }
 0x4fa   : > { %2533 = vrcp.f32 %v1394_v45 }
 0x4fb   : > { %v1397_v27 = vpop.xlane.xlu0 %1396 }
 0x4fc   : > { %2535 = vrcp.f32 %v1397_v27 }
 0x4fd   : > { %v1152_v31 = vpop.permute.xlu1 %1151 }
 0x4fe   : > { %v1239_v42 = vadd.f32 %v3201_v24, %v1152_v31  ;;  %v1241_v44 = vadd.f32 %v3203_v32, %v1152_v31 }
 0x501   : > { %v1460_v51 = vpop.permute.xlu1 %1459 }
 0x503   : > { %v1157_v26 = vpop.permute.xlu0 %1156 }
 0x504   : > { %v2534_v23 = vpop.eup %2533  ;;  %v1243_v50 = vadd.f32 %v3205_v40, %v1157_v26  ;;  %v1245_v52 = vadd.f32 %v3207_v6, %v1157_v26 }
 0x505   : > { %v1399_v49 = vmul.f32 %v2534_v23, %v3217_v17  ;;  %v1465_v58 = vpop.permute.xlu1 %1464 }
 0x506   : > { %v2536_v30 = vpop.eup %2535  ;;  %v1403_v53 = vpack.c.bf16 %v1243_v50, %v1239_v42  ;;  %v1404_v48 = vpack.c.bf16 %v1245_v52, %v1241_v44 }
 0x507   : > { %v1401_v47 = vmul.f32 %v2536_v30, %v3221_v2  ;;  %v1523_v62 = vpop.permute.xlu0 %1522 }
 0x508   : > { %1408 = vmatprep.subr.bf16.mxu1 %v1404_v48 }
 0x509   : > { %1409 = vmatpush1.bf16.msra.mxu1 %v1403_v53  ;;  %v1402_v54 = vpack.c.bf16 %v1401_v47, %v1399_v49  ;;  %v1528_v17 = vpop.permute.xlu1 %1527 }
 0x50c   : > { %2402 = vmatmul.mubr.msk.bf16.vlgmr.msra.gmra.mrb[8].mxu1 %vm1174_vm8, %v1402_v54 }
 0x50d   : > { %1507 = vmatprep.mubr.bf16.mxu1 %v2673_v1 }
 0x5df   : > { %v1442_v24 = vpop.f32.mrb[8].mxu1 }
 0x5e0   : > { %v1444_v32 = vpop.f32.mrb[9].mxu1 }
 0x5e1   : > { %v1446_v55 = vpop.f32.mrb[10].mxu1 }
 0x5e2   : > { %v1453_v40 = vpack.c.bf16 %v1446_v55, %v1442_v24  ;;  %v1448_v56 = vpop.f32.mrb[11].mxu1 }
 0x5e3   : > { %v1454_v6 = vpack.c.bf16 %v1448_v56, %v1444_v32 }
 0x5e5   : > { %1475 = vmatprep.subr.bf16.mxu1 %v1454_v6 }
 0x5e6   : > { %1476 = vmatpush1.bf16.msra.mxu1 %v1453_v40 }
 0x5e9   : > { %2404 = vmatmul.mubr.msk.bf16.vlgmr.msra.gmra.mrb[12].mxu1 %vm1174_vm8, %v2503_v57  ;;  %v1593_v57 = vpop.permute.xlu0 %1592 }
 0x5ea   : > { %2276 = vmatprep.mubr.bf16.mxu1 %v2673_v1 }
 0x6bc   : > { %v1509_v59 = vpop.f32.mrb[12].mxu1 }
 0x6bd   : > { %v1510_v18 = vadd.f32 %v1509_v59, %v1460_v51  ;;  %v1511_v61 = vpop.f32.mrb[13].mxu1 }
 0x6be   : > { %v1512_v34 = vadd.f32 %v1511_v61, %v1460_v51  ;;  %v1513_v35 = vpop.f32.mrb[14].mxu1  ;;  %v1598_v51 = vpop.permute.xlu1 %1597 }
 0x6bf   : > { %v1530_v33 = vmul.f32 %v1523_v62, %v1510_v18  ;;  %v1514_v36 = vadd.f32 %v1513_v35, %v1465_v58  ;;  %v1515_v63 = vpop.f32.mrb[15].mxu1 }
 0x6c0   : > { %v1531_v0 = vmul.f32 %v1523_v62, %v1512_v34  ;;  %v1516_v2 = vadd.f32 %v1515_v63, %v1465_v58 }
 0x6c1   : > { %v1532_v3 = vmul.f32 %v1528_v17, %v1514_v36  ;;  %v1534_v10 = vadd.f32 %v1530_v33, %v3128_v7  ;;  %v1607_v36 = vpop.permute.xlu0 %1606 }
 0x6c2   : > { %v1533_v9 = vmul.f32 %v1528_v17, %v1516_v2  ;;  %v1535_v16 = vadd.f32 %v1531_v0, %v3130_v8  ;;  %v1612_v63 = vpop.permute.xlu1 %1611 }
 0x6c3   : > { %v1536_v14 = vadd.f32 %v1532_v3, %v3124_v4 }
 0x6c4   : > { %v1537_v19 = vadd.f32 %v1533_v9, %v3126_v5 }
 0x6c5   : > { %v1542_v15 = vadd.f32 %v1536_v14, %v1534_v10 }
 0x6c6   : > { %v1549_v13 = vadd.f32 %v1537_v19, %v1535_v16 }
 0x6c7   : > { %v1543_v60 = vrot.slane %v1542_v15, 4 }
 0x6c8   : > { %v1550_v20 = vrot.slane %v1549_v13, 4 }
 0x6c9   : > { %v1544_v11 = vadd.f32 %v1543_v60, %v1542_v15  ;;  %v2505_v15 = vld [vmem:[%s3822_s16 + $0x8] sm:$0xff]   ;;  %v2507_v60 = vld [vmem:[%s3822_s16 + $0x18] sm:$0xff]  }
 0x6ca   : > { %v1551_v12 = vadd.f32 %v1550_v20, %v1549_v13  ;;  %v2506_v13 = vld [vmem:[%s3822_s16 + $0x10] sm:$0xff]   ;;  %v1639_v20 = vpop.permute.xlu0 %1638 }
 0x6cb   : > { %v1545_v21 = vrot.slane %v1544_v11, 2 }
 0x6cc   : > { %v1552_v22 = vrot.slane %v1551_v12, 2 }
 0x6cd   : > { %v1546_v25 = vadd.f32 %v1545_v21, %v1544_v11 }
 0x6ce   : > { %v1553_v28 = vadd.f32 %v1552_v22, %v1551_v12  ;;  %v1644_v22 = vpop.permute.xlu1 %1643 }
 0x6cf   : > { %v1547_v29 = vrot.slane %v1546_v25, 1 }
 0x6d0   : > { %v1554_v37 = vrot.slane %v1553_v28, 1 }
 0x6d1   : > { %v1548_v38 = vadd.f32 %v1547_v29, %v1546_v25 }
 0x6d2   : > { %v1555_v7 = vadd.f32 %v1554_v37, %v1553_v28 }
 0x6d3   : > { %v1556_v39 = vmul.f32 0.0625, %v1548_v38 }
 0x6d4   : > { %v1557_v4 = vmul.f32 0.0625, %v1555_v7 }
 0x6d5   : > { %v1558_v41 = vsub.f32 %v1534_v10, %v1556_v39  ;;  %v1560_v8 = vsub.f32 %v1536_v14, %v1556_v39 }
 0x6d6   : > { %v1559_v43 = vsub.f32 %v1535_v16, %v1557_v4  ;;  %v1561_v5 = vsub.f32 %v1537_v19, %v1557_v4  ;;  %v2504_v19 = vld [vmem:[%s3822_s16] sm:$0xff]  }
 0x6d7   : > { %v1562_v46 = vmul.f32 %v1558_v41, %v1558_v41  ;;  %v1564_v45 = vmul.f32 %v1560_v8, %v1560_v8 }
 0x6d8   : > { %v1563_v27 = vmul.f32 %v1559_v43, %v1559_v43  ;;  %v1565_v31 = vmul.f32 %v1561_v5, %v1561_v5 }
 0x6d9   : > { %v1566_v26 = vadd.f32 %v1564_v45, %v1562_v46 }
 0x6da   : > { %v1573_v23 = vadd.f32 %v1565_v31, %v1563_v27 }
 0x6db   : > { %v1567_v42 = vrot.slane %v1566_v26, 4 }
 0x6dc   : > { %v1574_v44 = vrot.slane %v1573_v23, 4 }
 0x6dd   : > { %v1568_v50 = vadd.f32 %v1567_v42, %v1566_v26 }
 0x6de   : > { %v1575_v52 = vadd.f32 %v1574_v44, %v1573_v23 }
 0x6df   : > { %v1569_v30 = vrot.slane %v1568_v50, 2 }
 0x6e0   : > { %v1576_v53 = vrot.slane %v1575_v52, 2 }
 0x6e1   : > { %v1570_v48 = vadd.f32 %v1569_v30, %v1568_v50  ;;  %v1649_v30 = vpop.permute.xlu0 %1648 }
 0x6e2   : > { %v1577_v49 = vadd.f32 %v1576_v53, %v1575_v52 }
 0x6e3   : > { %v1571_v47 = vrot.slane %v1570_v48, 1 }
 0x6e4   : > { %v1578_v54 = vrot.slane %v1577_v49, 1 }
 0x6e5   : > { %v1572_v24 = vadd.f32 %v1571_v47, %v1570_v48  ;;  %v1654_v48 = vpop.permute.xlu1 %1653 }
 0x6e6   : > { %v1579_v32 = vadd.f32 %v1578_v54, %v1577_v49 }
 0x6e7   : > { %v1580_v55 = vmul.f32 0.0625, %v1572_v24 }
 0x6e8   : > { %v1581_v40 = vmul.f32 0.0625, %v1579_v32 }
 0x6e9   : > { %v1582_v56 = vadd.f32 1e-06, %v1580_v55 }
 0x6ea   : > { %v1583_v6 = vadd.f32 1e-06, %v1581_v40 }
 0x6eb   : > { %2537 = vrsqrt.f32 %v1582_v56 }
 0x6ec   : > { %2539 = vrsqrt.f32 %v1583_v6 }
 0x6f5   : > { %v2538_v58 = vpop.eup %2537 }
 0x6f6   : > { %v2540_v59 = vpop.eup %2539  ;;  %v1586_v18 = vmul.f32 %v2538_v58, %v1558_v41  ;;  %v1588_v61 = vmul.f32 %v2538_v58, %v1560_v8 }
 0x6f7   : > { %v1589_v62 = vmul.f32 %v2540_v59, %v1561_v5  ;;  %v1587_v34 = vmul.f32 %v2540_v59, %v1559_v43 }
 0x6f8   : > { %v1602_v35 = vmul.f32 %v1598_v51, %v1588_v61  ;;  %v1600_v33 = vmul.f32 %v1593_v57, %v1586_v18 }
 0x6f9   : > { %v1601_v17 = vmul.f32 %v1593_v57, %v1587_v34  ;;  %v1603_v0 = vmul.f32 %v1598_v51, %v1589_v62 }
 0x6fa   : > { %v1614_v2 = vadd.f32 %v1607_v36, %v1600_v33  ;;  %v1616_v3 = vadd.f32 %v1612_v63, %v1602_v35 }
 0x6fb   : > { %v1615_v9 = vadd.f32 %v1607_v36, %v1601_v17  ;;  %v1617_v10 = vadd.f32 %v1612_v63, %v1603_v0 }
 0x6fc   : > { %v1626_v14 = vpack.c.bf16 %v1616_v3, %v1614_v2 }
 0x6fd   : > { %v1627_v16 = vpack.c.bf16 %v1617_v10, %v1615_v9 }
 0x6ff   : > { %1708 = vmatprep.subr.bf16.mxu0 %v1627_v16 }
 0x700   : > { %1709 = vmatpush1.bf16.msra.mxu0 %v1626_v14 }
 0x703   : > { %2409 = vmatmul.mubr.msk.bf16.vlgmr.msra.gmra.mrb[8].mxu0 %vm1174_vm8, %v2504_v19 }
 0x704   : > { %1750 = vmatprep.mubr.bf16.mxu0 %v2673_v1 }
 0x70b   : > { %2410 = vmatmul.mubr.msk.bf16.gmra.mrb[12].mxu0 %vm1174_vm8, %v2505_v15 }
 0x70c   : > { %1760 = vmatprep.mubr.bf16.mxu0 %v2673_v1 }
 0x713   : > { %2411 = vmatmul.mubr.msk.bf16.gmra.mrb[16].mxu0 %vm1174_vm8, %v2506_v13 }
 0x714   : > { %1770 = vmatprep.mubr.bf16.mxu0 %v2673_v1 }
 0x71b   : > { %2412 = vmatmul.mubr.msk.bf16.gmra.mrb[20].mxu0 %vm1174_vm8, %v2507_v60  ;;  %v2690_v60 = vmov -1.0  }
 0x7d6   : > { %v1742_v11 = vpop.f32.mrb[8].mxu0 }
 0x7d7   : > { %v1743_v12 = vadd.f32 %v1742_v11, %v1639_v20  ;;  %v1744_v21 = vpop.f32.mrb[9].mxu0 }
 0x7d8   : > { %v1745_v25 = vadd.f32 %v1744_v21, %v1639_v20  ;;  %v1746_v28 = vpop.f32.mrb[10].mxu0 }
 0x7d9   : > { %v3327_v29 = vmul.f32 0.70710677, %v1743_v12  ;;  %v1747_v37 = vadd.f32 %v1746_v28, %v1644_v22  ;;  %v1748_v38 = vpop.f32.mrb[11].mxu0  ;;  %v3374_v62 = vmul.f32 0.5, %v1743_v12 }
 0x7da   : > { %v3329_v7 = vmul.f32 0.70710677, %v1745_v25  ;;  %v3334_v4 = vadd.f32 %v1748_v38, %v1644_v22  ;;  %v3377_v34 = vmul.f32 0.5, %v1745_v25 }
 0x7db   : > { %v1845_v1 = vand.u32 2147483647, %v3327_v29  ;;  %v3332_v39 = vmul.f32 0.70710677, %v1747_v37  ;;  %vm1813_vm1 = vcmp.ge.f32.partialorder %v3327_v29, 0.0  ;;  %v3389_v10 = vmul.f32 0.5, %v1747_v37 }
 0x7dc   : > { %v1846_v41 = vand.u32 2147483647, %v3329_v7  ;;  %v3339_v45 = vmul.f32 0.70710677, %v3334_v4  ;;  %v3398_v20 = vsel %vm1813_vm1, 1.0, %v2690_v60  ;;  %vm1814_vm2 = vcmp.ge.f32.partialorder %v3329_v7, 0.0 }
 0x7dd   : > { %v1861_v8 = vmul.f32 0.3275911, %v1845_v1  ;;  %v1847_v5 = vand.u32 2147483647, %v3332_v39  ;;  %v2069_v40 = vsub.f32 0.0, %v1845_v1  ;;  %vm1815_vm3 = vcmp.ge.f32.partialorder %v3332_v39, 0.0 }
 0x7de   : > { %v1862_v43 = vmul.f32 0.3275911, %v1846_v41  ;;  %v1752_v27 = vpop.f32.mrb[12].mxu0  ;;  %v3342_v42 = vand.u32 2147483647, %v3339_v45  ;;  %v2070_v57 = vsub.f32 0.0, %v1846_v41 }
 0x7df   : > { %v1877_v46 = vadd.f32 1.0, %v1861_v8  ;;  %v1863_v26 = vmul.f32 0.3275911, %v1847_v5  ;;  %v1754_v23 = vpop.f32.mrb[13].mxu0  ;;  %v3345_v49 = vadd.f32 %v1752_v27, %v1649_v30  ;;  %v2085_v36 = vmul.f32 %v2069_v40, %v1845_v1 }
 0x7e0   : > { %v1878_v31 = vadd.f32 1.0, %v1862_v43  ;;  %v1756_v44 = vpop.f32.mrb[14].mxu0  ;;  %v1864_v53 = vmul.f32 0.3275911, %v3342_v42  ;;  %v3347_v47 = vadd.f32 %v1754_v23, %v1649_v30  ;;  %v2071_v63 = vsub.f32 0.0, %v1847_v5 }
 0x7e1   : > { %2541 = vrcp.f32 %v1877_v46  ;;  %v1879_v50 = vadd.f32 1.0, %v1863_v26  ;;  %v1758_v52 = vpop.f32.mrb[15].mxu0  ;;  %v3349_v24 = vadd.f32 %v1756_v44, %v1654_v48  ;;  %v3352_v32 = vmul.f32 0.70710677, %v3345_v49 }
 0x7e2   : > { %2543 = vrcp.f32 %v1878_v31  ;;  %v1880_v54 = vadd.f32 1.0, %v1864_v53  ;;  %v3357_v56 = vmul.f32 0.70710677, %v3347_v47  ;;  %v2086_v9 = vmul.f32 %v2070_v57, %v1846_v41  ;;  %v3447_v57 = vpop.permute.xlu0 %1658 }
 0x7e3   : > { %2545 = vrcp.f32 %v1879_v50  ;;  %v3362_v51 = vand.u32 2147483647, %v3352_v32  ;;  %v3365_v58 = vmul.f32 0.70710677, %v3349_v24  ;;  %v3393_v13 = vadd.f32 %v1758_v52, %v1654_v48 }
 0x7e4   : > { %2547 = vrcp.f32 %v1880_v54  ;;  %v3370_v18 = vand.u32 2147483647, %v3357_v56  ;;  %v2101_v22 = vmul.f32 1.442695, %v2085_v36  ;;  %v2087_v25 = vmul.f32 %v2071_v63, %v1847_v5 }
 0x7e5   : > { %v1865_v35 = vmul.f32 0.3275911, %v3362_v51  ;;  %v3384_v0 = vand.u32 2147483647, %v3365_v58  ;;  %v2103_v1 = vmul.f32 1.442695, %v2086_v9 }
 0x7e6   : > { %v3354_v55 = vpop.f32.mrb[16].mxu0  ;;  %v1866_v17 = vmul.f32 0.3275911, %v3370_v18  ;;  %vm1816_vm4 = vcmp.ge.f32.partialorder %v3339_v45, 0.0  ;;  %v3416_v5 = vmul.f32 0.70710677, %v3393_v13 }
 0x7e7   : > { %v3359_v6 = vpop.f32.mrb[17].mxu0  ;;  %v1881_v14 = vadd.f32 1.0, %v1865_v35  ;;  %v1867_v15 = vmul.f32 0.3275911, %v3384_v0  ;;  %v2105_v23 = vmul.f32 1.442695, %v2087_v25 }
 0x7e8   : > { %v3367_v59 = vpop.f32.mrb[18].mxu0  ;;  %v1882_v19 = vadd.f32 1.0, %v1866_v17  ;;  %v3422_v44 = vmul.f32 0.5, %v3334_v4  ;;  %v2073_v50 = vsub.f32 0.0, %v3362_v51  ;;  %v3429_v30 = vsel %vm1814_vm2, 1.0, %v2690_v60 }
 0x7e9   : > { %v3372_v61 = vpop.f32.mrb[19].mxu0  ;;  %2549 = vrcp.f32 %v1881_v14  ;;  %v1883_v28 = vadd.f32 1.0, %v1867_v15  ;;  %v2072_v48 = vsub.f32 0.0, %v3342_v42  ;;  %v3437_v4 = vsel %vm1815_vm3, 1.0, %v2690_v60 }
 0x7ea   : > { %2551 = vrcp.f32 %v1882_v19  ;;  %v3442_v40 = vsel %vm1816_vm4, 1.0, %v2690_v60  ;;  %v3445_v7 = vand.u32 2147483647, %v3416_v5  ;;  %v2089_v17 = vmul.f32 %v2073_v50, %v3362_v51 }
 0x7eb   : > { %v3380_v33 = vpop.eup %2541  ;;  %2553 = vrcp.f32 %v1883_v28  ;;  %v2075_v19 = vsub.f32 0.0, %v3384_v0  ;;  %v3464_v51 = vmul.f32 0.5, %v3345_v49  ;;  %vm1817_vm5 = vcmp.ge.f32.partialorder %v3352_v32, 0.0 }
 0x7ec   : > { %v3386_v2 = vpop.eup %2543  ;;  %v1925_v3 = vmul.f32 1.0614054, %v3380_v33  ;;  %2555 = vpow2.f32 %v2101_v22  ;;  %v1868_v39 = vmul.f32 0.3275911, %v3445_v7  ;;  %vm1818_vm6 = vcmp.ge.f32.partialorder %v3357_v56, 0.0 }
 0x7ed   : > { %v1926_v16 = vmul.f32 1.0614054, %v3386_v2  ;;  %v3403_v21 = vpop.eup %2545  ;;  %2557 = vpow2.f32 %v2103_v1  ;;  %vm1819_vm7 = vcmp.ge.f32.partialorder %v3365_v58, 0.0  ;;  %vm1820_vm8 = vcmp.ge.f32.partialorder %v3416_v5, 0.0 }
 0x7ee   : > { %v1941_v11 = vadd.f32 -1.4531521, %v1925_v3  ;;  %v3401_v12 = vpop.f32.mrb[20].mxu0  ;;  %v1927_v29 = vmul.f32 1.0614054, %v3403_v21  ;;  %v3412_v8 = vpop.eup %2547  ;;  %2559 = vpow2.f32 %v2105_v23  ;;  %v3453_v3 = vadd.f32 %v3354_v55, %v3447_v57 }
 0x7ef   : > { %v3405_v37 = vpop.f32.mrb[21].mxu0  ;;  %v1942_v43 = vadd.f32 -1.4531521, %v1926_v16  ;;  %v1928_v26 = vmul.f32 1.0614054, %v3412_v8  ;;  %v2088_v16 = vmul.f32 %v2072_v48, %v3342_v42  ;;  %v1884_v55 = vadd.f32 1.0, %v1868_v39 }
 0x7f0   : > { %v1957_v38 = vmul.f32 %v3380_v33, %v1941_v11  ;;  %v3410_v41 = vpop.f32.mrb[22].mxu0  ;;  %v1943_v31 = vadd.f32 -1.4531521, %v1927_v29  ;;  %v3470_v42 = vmul.f32 0.70710677, %v3453_v3  ;;  %v2091_v23 = vmul.f32 %v2075_v19, %v3384_v0 }
 0x7f1   : > { %v3418_v46 = vpop.f32.mrb[23].mxu0  ;;  %v1958_v54 = vmul.f32 %v3386_v2, %v1942_v43  ;;  %v1944_v63 = vadd.f32 -1.4531521, %v1928_v26  ;;  %v2109_v43 = vmul.f32 1.442695, %v2089_v17  ;;  %2561 = vrcp.f32 %v1884_v55 }
 0x7f2   : > { %v1973_v27 = vadd.f32 1.4214138, %v1957_v38  ;;  %v1959_v53 = vmul.f32 %v3403_v21, %v1943_v31  ;;  %v3480_v48 = vmul.f32 0.5, %v3347_v47  ;;  %v2107_v17 = vmul.f32 1.442695, %v2088_v16 }
 0x7f3   : > { %v3455_v45 = vpop.eup %2549  ;;  %v1974_v11 = vadd.f32 1.4214138, %v1958_v54  ;;  %v1960_v38 = vmul.f32 %v3412_v8, %v1944_v63  ;;  %2563 = vpow2.f32 %v2109_v43  ;;  %vm1821_vm9 = vcmp.ge.f32.partialorder %v3470_v42, 0.0 }
 0x7f4   : > { %v1989_v52 = vmul.f32 %v3380_v33, %v1973_v27  ;;  %v1975_v36 = vadd.f32 1.4214138, %v1959_v53  ;;  %v3461_v15 = vpop.eup %2551  ;;  %v1929_v22 = vmul.f32 1.0614054, %v3455_v45  ;;  %vm2240_vm1 = vcmask 523264  }
 0x7f5   : > { %v1930_v1 = vmul.f32 1.0614054, %v3461_v15  ;;  %v3472_v27 = vpop.eup %2553  ;;  %v1976_v63 = vadd.f32 1.4214138, %v1960_v38 }
 0x7f6   : > { %v2005_v35 = vadd.f32 -0.28449672, %v1989_v52  ;;  %v1991_v14 = vmul.f32 %v3403_v21, %v1975_v36  ;;  %v1945_v29 = vadd.f32 -1.4531521, %v1929_v22  ;;  %v2556_v50 = vpop.eup %2555  ;;  %v1990_v52 = vmul.f32 %v3386_v2, %v1974_v11 }
 0x7f7   : > { %v1946_v26 = vadd.f32 -1.4531521, %v1930_v1  ;;  %v1931_v54 = vmul.f32 1.0614054, %v3472_v27  ;;  %v3486_v0 = vpop.eup %2557  ;;  %v2113_v11 = vmul.f32 1.442695, %v2091_v23 }
 0x7f8   : > { %v2021_v9 = vmul.f32 %v3380_v33, %v2005_v35  ;;  %v2007_v28 = vadd.f32 -0.28449672, %v1991_v14  ;;  %v1961_v53 = vmul.f32 %v3455_v45, %v1945_v29  ;;  %v2560_v22 = vpop.eup %2559  ;;  %v2006_v55 = vadd.f32 -0.28449672, %v1990_v52 }
 0x7f9   : > { %v1947_v39 = vadd.f32 -1.4531521, %v1931_v54  ;;  %v1962_v47 = vmul.f32 %v3461_v15, %v1946_v26  ;;  %v1992_v29 = vmul.f32 %v3412_v8, %v1976_v63  ;;  %2565 = vpow2.f32 %v2113_v11 }
 0x7fa   : > { %v2037_v25 = vadd.f32 0.2548296, %v2021_v9  ;;  %v2023_v31 = vmul.f32 %v3403_v21, %v2007_v28  ;;  %v3484_v9 = vand.u32 2147483647, %v3470_v42 }
 0x7fb   : > { %v1963_v16 = vmul.f32 %v3472_v27, %v1947_v39  ;;  %v1978_v23 = vadd.f32 1.4214138, %v1962_v47  ;;  %v3498_v52 = vpop.eup %2561  ;;  %v2008_v63 = vadd.f32 -0.28449672, %v1992_v29 }
 0x7fc   : > { %v2053_v49 = vmul.f32 %v3380_v33, %v2037_v25  ;;  %v2039_v36 = vadd.f32 0.2548296, %v2023_v31  ;;  %v1977_v33 = vadd.f32 1.4214138, %v1961_v53  ;;  %v1869_v28 = vmul.f32 0.3275911, %v3484_v9 }
 0x7fd   : > { %v2022_v53 = vmul.f32 %v3386_v2, %v2006_v55  ;;  %v1994_v11 = vmul.f32 %v3461_v15, %v1978_v23 }
 0x7fe   : > { %v2133_v35 = vmul.f32 %v2556_v50, %v2053_v49  ;;  %v2055_v19 = vmul.f32 %v3403_v21, %v2039_v36  ;;  %v1993_v25 = vmul.f32 %v3455_v45, %v1977_v33  ;;  %v2074_v21 = vsub.f32 0.0, %v3370_v18 }
 0x7ff   : > { %v1979_v49 = vadd.f32 1.4214138, %v1963_v16  ;;  %v1885_v31 = vadd.f32 1.0, %v1869_v28  ;;  %v2076_v50 = vsub.f32 0.0, %v3445_v7  ;;  %v2038_v16 = vadd.f32 0.2548296, %v2022_v53 }
 0x800   : > { %v2149_v14 = vsub.f32 1.0, %v2133_v35  ;;  %v2135_v1 = vmul.f32 %v2560_v22, %v2055_v19  ;;  %v2009_v43 = vadd.f32 -0.28449672, %v1993_v25  ;;  %v3507_v19 = vadd.f32 %v3359_v6, %v3447_v57  ;;  %v2564_v25 = vpop.eup %2563 }
 0x801   : > { %v1995_v54 = vmul.f32 %v3472_v27, %v1979_v49  ;;  %2567 = vrcp.f32 %v1885_v31  ;;  %v2090_v22 = vmul.f32 %v2074_v21, %v3370_v18  ;;  %v2092_v55 = vmul.f32 %v2076_v50, %v3445_v7  ;;  %v1664_v50 = vpop.permute.xlu1 %1663 }
 0x802   : > { %v2165_v38 = vmul.f32 %v2149_v14, %v3398_v20  ;;  %v2151_v26 = vsub.f32 1.0, %v2135_v1  ;;  %v2025_v20 = vmul.f32 %v3455_v45, %v2009_v43  ;;  %2569 = vpow2.f32 %v2107_v17 }
 0x803   : > { %v2011_v39 = vadd.f32 -0.28449672, %v1995_v54  ;;  %v1932_v14 = vmul.f32 1.0614054, %v3498_v52  ;;  %v2024_v57 = vmul.f32 %v3412_v8, %v2008_v63  ;;  %v1833_v18 = vsel %vm1817_vm5, 1.0, %v2690_v60  ;;  %v2566_v23 = vpop.eup %2565 }
 0x804   : > { %v2181_v35 = vadd.f32 1.0, %v2165_v38  ;;  %v2167_v36 = vmul.f32 %v2151_v26, %v3437_v4  ;;  %v2041_v33 = vadd.f32 0.2548296, %v2025_v20  ;;  %v2010_v43 = vadd.f32 -0.28449672, %v1994_v11 }
 0x805   : > { %v2027_v17 = vmul.f32 %v3472_v27, %v2011_v39  ;;  %v1948_v28 = vadd.f32 -1.4531521, %v1932_v14  ;;  %v2111_v21 = vmul.f32 1.442695, %v2090_v22  ;;  %v2054_v49 = vmul.f32 %v3386_v2, %v2038_v16 }
 0x806   : > { %v2183_v47 = vadd.f32 1.0, %v2167_v36  ;;  %v2057_v4 = vmul.f32 %v3455_v45, %v2041_v33  ;;  %v3515_v38 = vmul.f32 %v2181_v35, %v3374_v62  ;;  %v3526_v45 = vmul.f32 0.70710677, %v3507_v19 }
 0x807   : > { %v2043_v1 = vadd.f32 0.2548296, %v2027_v17  ;;  %v1964_v29 = vmul.f32 %v3498_v52, %v1948_v28  ;;  %v2040_v53 = vadd.f32 0.2548296, %v2024_v57  ;;  %v3541_v63 = vadd.f32 %v3367_v59, %v1664_v50 }
 0x808   : > { %v3518_v6 = vmul.f32 %v2183_v47, %v3389_v10  ;;  %v2137_v7 = vmul.f32 %v2564_v25, %v2057_v4  ;;  %v2115_v10 = vmul.f32 1.442695, %v2092_v55  ;;  %v3535_v20 = vand.u32 2147483647, %v3526_v45 }
 0x809   : > { %v2059_v26 = vmul.f32 %v3472_v27, %v2043_v1  ;;  %v1980_v32 = vadd.f32 1.4214138, %v1964_v29  ;;  %v2026_v33 = vmul.f32 %v3461_v15, %v2010_v43  ;;  %2571 = vpow2.f32 %v2111_v21 }
 0x80a   : > { %v2215_v62 = vpack.c.bf16 %v3518_v6, %v3515_v38  ;;  %v2153_v31 = vsub.f32 1.0, %v2137_v7  ;;  %v1870_v14 = vmul.f32 0.3275911, %v3535_v20  ;;  %v2134_v47 = vmul.f32 %v3486_v0, %v2054_v49 }
 0x80b   : > { %v3537_v54 = vpop.eup %2567  ;;  %v2139_v36 = vmul.f32 %v2566_v23, %v2059_v26  ;;  %v1996_v2 = vmul.f32 %v3498_v52, %v1980_v32  ;;  %2573 = vpow2.f32 %v2115_v10  ;;  %v2056_v55 = vmul.f32 %v3412_v8, %v2040_v53 }
 0x80c   : > { %v2169_v35 = vmul.f32 %v2153_v31, %v1833_v18  ;;  %v2570_v27 = vpop.eup %2569  ;;  %v1933_v39 = vmul.f32 1.0614054, %v3537_v54  ;;  %v1835_v59 = vsel %vm1819_vm7, 1.0, %v2690_v60  ;;  %v1886_v16 = vadd.f32 1.0, %v1870_v14  ;;  %v1669_v31 = vpop.permute.xlu0 %1668 }
 0x80d   : > { %v2155_v11 = vsub.f32 1.0, %v2139_v36  ;;  %v2012_v22 = vadd.f32 -0.28449672, %v1996_v2  ;;  %v3553_v57 = vmul.f32 0.70710677, %v3541_v63  ;;  %v1787_v0 = vmul.f32 0.5, %v3349_v24 }
 0x80e   : > { %v1949_v25 = vadd.f32 -1.4531521, %v1933_v39  ;;  %v2185_v4 = vadd.f32 1.0, %v2169_v35  ;;  %v2042_v18 = vadd.f32 0.2548296, %v2026_v33  ;;  %2575 = vrcp.f32 %v1886_v16 }
 0x80f   : > { %v2171_v17 = vmul.f32 %v2155_v11, %v1835_v59  ;;  %v2028_v28 = vmul.f32 %v3498_v52, %v2012_v22  ;;  %v2150_v8 = vsub.f32 1.0, %v2134_v47  ;;  %v1855_v58 = vand.u32 2147483647, %v3553_v57 }
 0x810   : > { %v1965_v7 = vmul.f32 %v3537_v54, %v1949_v25  ;;  %v2136_v43 = vmul.f32 %v2570_v27, %v2056_v55  ;;  %v1834_v21 = vsel %vm1818_vm6, 1.0, %v2690_v60  ;;  %v3562_v49 = vadd.f32 %v3372_v61, %v1664_v50 }
 0x811   : > { %v2187_v1 = vadd.f32 1.0, %v2171_v17  ;;  %v2044_v29 = vadd.f32 0.2548296, %v2028_v28  ;;  %v3565_v24 = vmul.f32 %v2185_v4, %v3464_v51  ;;  %v2077_v32 = vsub.f32 0.0, %v3484_v9 }
 0x812   : > { %v1981_v10 = vadd.f32 1.4214138, %v1965_v7  ;;  %v1871_v23 = vmul.f32 0.3275911, %v1855_v58  ;;  %v2058_v53 = vmul.f32 %v3461_v15, %v2042_v18  ;;  %v3573_v56 = vmul.f32 0.70710677, %v3562_v49 }
 0x813   : > { %v3567_v26 = vmul.f32 %v2187_v1, %v1787_v0  ;;  %v2060_v35 = vmul.f32 %v3498_v52, %v2044_v29  ;;  %v3576_v36 = vadd.f32 %v3401_v12, %v1669_v31  ;;  %v2166_v61 = vmul.f32 %v2150_v8, %v3429_v30  ;;  %v2572_v2 = vpop.eup %2571 }
 0x814   : > { %v1887_v50 = vadd.f32 1.0, %v1871_v23  ;;  %v2152_v27 = vsub.f32 1.0, %v2136_v43  ;;  %v1997_v15 = vmul.f32 %v3537_v54, %v1981_v10  ;;  %v3585_v52 = vand.u32 2147483647, %v3573_v56 }
 0x815   : > { %v2217_v51 = vpack.c.bf16 %v3567_v26, %v3565_v24  ;;  %v2574_v33 = vpop.eup %2573  ;;  %v3588_v12 = vmul.f32 0.5, %v3393_v13  ;;  %v3591_v30 = vmul.f32 0.5, %v3453_v3  ;;  %v2093_v39 = vmul.f32 %v2077_v32, %v3484_v9  ;;  %v1674_v9 = vpop.permute.xlu1 %1673 }
 0x816   : > { %2577 = vrcp.f32 %v1887_v50  ;;  %v2138_v14 = vmul.f32 %v2572_v2, %v2058_v53  ;;  %v2140_v47 = vmul.f32 %v2574_v33, %v2060_v35  ;;  %v1872_v11 = vmul.f32 0.3275911, %v3585_v52 }
 0x817   : > { %v3596_v42 = vmul.f32 0.70710677, %v3576_v36  ;;  %v2182_v22 = vadd.f32 1.0, %v2166_v61  ;;  %v1836_v55 = vsel %vm1820_vm8, 1.0, %v2690_v60  ;;  %v3602_v13 = vsel %vm1821_vm9, 1.0, %v2690_v60 }
 0x818   : > { %v2078_v3 = vsub.f32 0.0, %v3535_v20  ;;  %v3605_v59 = vpop.eup %2575  ;;  %v2168_v25 = vmul.f32 %v2152_v27, %v3442_v40  ;;  %v2013_v16 = vadd.f32 -0.28449672, %v1997_v15  ;;  %v1888_v4 = vadd.f32 1.0, %v1872_v11 }
 0x819   : > { %v3609_v17 = vadd.f32 %v3405_v37, %v1669_v31  ;;  %v1934_v28 = vmul.f32 1.0614054, %v3605_v59  ;;  %v2079_v18 = vsub.f32 0.0, %v1855_v58  ;;  %v3613_v5 = vand.u32 2147483647, %v3596_v42 }
 0x81a   : > { %v3616_v0 = vadd.f32 %v3410_v41, %v1674_v9  ;;  %v2154_v7 = vsub.f32 1.0, %v2138_v14  ;;  %v2156_v8 = vsub.f32 1.0, %v2140_v47  ;;  %v2117_v1 = vmul.f32 1.442695, %v2093_v39 }
 0x81b   : > { %2579 = vrcp.f32 %v1888_v4  ;;  %v3619_v40 = vmul.f32 %v2182_v22, %v3377_v34  ;;  %v1950_v29 = vadd.f32 -1.4531521, %v1934_v28  ;;  %v2094_v37 = vmul.f32 %v2078_v3, %v3535_v20 }
 0x81c   : > { %v1873_v43 = vmul.f32 0.3275911, %v3613_v5  ;;  %v2184_v10 = vadd.f32 1.0, %v2168_v25  ;;  %v2029_v31 = vmul.f32 %v3537_v54, %v2013_v16  ;;  %v3625_v32 = vmul.f32 0.5, %v3507_v19 }
 0x81d   : > { %v3628_v41 = vmul.f32 0.70710677, %v3609_v17  ;;  %v1966_v23 = vmul.f32 %v3605_v59, %v1950_v29  ;;  %v2095_v53 = vmul.f32 %v2079_v18, %v1855_v58  ;;  %v3632_v34 = vmul.f32 0.70710677, %v3616_v0 }
 0x81e   : > { %v1889_v35 = vadd.f32 1.0, %v1873_v43  ;;  %v2170_v61 = vmul.f32 %v2154_v7, %v1834_v21  ;;  %v2172_v20 = vmul.f32 %v2156_v8, %v1836_v55  ;;  %2581 = vpow2.f32 %v2117_v1 }
 0x81f   : > { %v3635_v50 = vand.u32 2147483647, %v3628_v41  ;;  %v1982_v19 = vadd.f32 1.4214138, %v1966_v23  ;;  %v2119_v27 = vmul.f32 1.442695, %v2094_v37  ;;  %v2200_v33 = vmul.f32 %v2184_v10, %v3422_v44 }
 0x820   : > { %v3637_v2 = vpop.eup %2577  ;;  %v2080_v15 = vsub.f32 0.0, %v3585_v52  ;;  %2583 = vrcp.f32 %v1889_v35  ;;  %v2045_v58 = vadd.f32 0.2548296, %v2029_v31  ;;  %vm1822_vm10 = vcmp.ge.f32.partialorder %v3526_v45, 0.0 }
 0x821   : > { %v1935_v39 = vmul.f32 1.0614054, %v3637_v2  ;;  %v1874_v14 = vmul.f32 0.3275911, %v3635_v50  ;;  %v1998_v21 = vmul.f32 %v3605_v59, %v1982_v19  ;;  %v2121_v47 = vmul.f32 1.442695, %v2095_v53 }
 0x822   : > { %v3646_v11 = vand.u32 2147483647, %v3632_v34  ;;  %v2188_v22 = vadd.f32 1.0, %v2172_v20  ;;  %v3649_v25 = vadd.f32 %v3418_v46, %v1674_v9  ;;  %v2186_v44 = vadd.f32 1.0, %v2170_v61 }
 0x823   : > { %v1951_v55 = vadd.f32 -1.4531521, %v1935_v39  ;;  %v1890_v3 = vadd.f32 1.0, %v1874_v14  ;;  %v2014_v16 = vadd.f32 -0.28449672, %v1998_v21  ;;  %2585 = vpow2.f32 %v2119_v27 }
 0x824   : > { %v1875_v4 = vmul.f32 0.3275911, %v3646_v11  ;;  %v2061_v18 = vmul.f32 %v3537_v54, %v2045_v58  ;;  %v2096_v8 = vmul.f32 %v2080_v15, %v3585_v52  ;;  %v2081_v46 = vsub.f32 0.0, %v3613_v5 }
 0x825   : > { %v3652_v28 = vpop.eup %2579  ;;  %v1967_v7 = vmul.f32 %v3637_v2, %v1951_v55  ;;  %2587 = vrcp.f32 %v1890_v3  ;;  %v2030_v1 = vmul.f32 %v3605_v59, %v2014_v16  ;;  %v2204_v37 = vmul.f32 %v2188_v22, %v3588_v12 }
 0x826   : > { %v1936_v29 = vmul.f32 1.0614054, %v3652_v28  ;;  %v1891_v9 = vadd.f32 1.0, %v1875_v4  ;;  %2589 = vpow2.f32 %v2121_v47  ;;  %v3662_v10 = vmul.f32 0.70710677, %v3649_v25 }
 0x827   : > { %v1983_v43 = vadd.f32 1.4214138, %v1967_v7  ;;  %v2202_v54 = vmul.f32 %v2186_v44, %v3480_v48  ;;  %v2046_v31 = vadd.f32 0.2548296, %v2030_v1  ;;  %v2123_v35 = vmul.f32 1.442695, %v2096_v8 }
 0x828   : > { %v1952_v23 = vadd.f32 -1.4531521, %v1936_v29  ;;  %2591 = vrcp.f32 %v1891_v9  ;;  %v2582_v52 = vpop.eup %2581  ;;  %v3667_v61 = vand.u32 2147483647, %v3662_v10  ;;  %v2216_v20 = vpack.c.bf16 %v2200_v33, %v3619_v40 }
 0x829   : > { %v1999_v53 = vmul.f32 %v3637_v2, %v1983_v43  ;;  %v2141_v19 = vmul.f32 %v2582_v52, %v2061_v18  ;;  %v3675_v27 = vsel %vm1822_vm10, 1.0, %v2690_v60  ;;  %v2097_v15 = vmul.f32 %v2081_v46, %v3613_v5 }
 0x82a   : > { %v3670_v12 = vpop.eup %2583  ;;  %v1968_v48 = vmul.f32 %v3652_v28, %v1952_v23  ;;  %v1876_v14 = vmul.f32 0.3275911, %v3667_v61  ;;  %2244 = vmatprep.subr.bf16.mxu1 %v2216_v20  ;;  %v2218_v21 = vpack.c.bf16 %v2204_v37, %v2202_v54  ;;  %v2062_v40 = vmul.f32 %v3605_v59, %v2046_v31 }
 0x82b   : > { %v2015_v58 = vadd.f32 -0.28449672, %v1999_v53  ;;  %v1937_v39 = vmul.f32 1.0614054, %v3670_v12  ;;  %v3683_v33 = vmul.f32 0.5, %v3541_v63  ;;  %v2082_v45 = vsub.f32 0.0, %v3635_v50  ;;  %2245 = vmatpush1.bf16.msra.mxu1 %v2215_v62 }
 0x82c   : > { %v1984_v47 = vadd.f32 1.4214138, %v1968_v48  ;;  %2593 = vpow2.f32 %v2123_v35  ;;  %v1892_v55 = vadd.f32 1.0, %v1876_v14  ;;  %2246 = vmatprep.subr.bf16.mxu1 %v2218_v21  ;;  %vm1823_vm11 = vcmp.ge.f32.partialorder %v3553_v57, 0.0 }
 0x82d   : > { %v2031_v5 = vmul.f32 %v3637_v2, %v2015_v58  ;;  %v1953_v22 = vadd.f32 -1.4531521, %v1937_v39  ;;  %v2586_v3 = vpop.eup %2585  ;;  %v2125_v63 = vmul.f32 1.442695, %v2097_v15  ;;  %v2083_v44 = vsub.f32 0.0, %v3646_v11 }
 0x82e   : > { %v2000_v59 = vmul.f32 %v3652_v28, %v1984_v47  ;;  %v2157_v4 = vsub.f32 1.0, %v2141_v19  ;;  %2595 = vrcp.f32 %v1892_v55  ;;  %v2142_v6 = vmul.f32 %v2586_v3, %v2062_v40 }
 0x82f   : > { %v3693_v16 = vpop.eup %2587  ;;  %v2047_v18 = vadd.f32 0.2548296, %v2031_v5  ;;  %v1969_v38 = vmul.f32 %v3670_v12, %v1953_v22  ;;  %v2098_v8 = vmul.f32 %v2082_v45, %v3635_v50  ;;  %2247 = vmatpush1.bf16.msra.mxu1 %v2217_v51  ;;  %v1839_v1 = vsel %vm1823_vm11, 1.0, %v2690_v60 }
 0x830   : > { %v2016_v62 = vadd.f32 -0.28449672, %v2000_v59  ;;  %v1938_v7 = vmul.f32 1.0614054, %v3693_v16  ;;  %v2590_v57 = vpop.eup %2589  ;;  %vm1824_vm12 = vcmp.ge.f32.partialorder %v3573_v56, 0.0  ;;  %2597 = vpow2.f32 %v2125_v63 }
 0x831   : > { %v2063_v29 = vmul.f32 %v3637_v2, %v2047_v18  ;;  %v1985_v46 = vadd.f32 1.4214138, %v1969_v38  ;;  %v2099_v50 = vmul.f32 %v2083_v44, %v3646_v11  ;;  %v2173_v54 = vmul.f32 %v2157_v4, %v3602_v13 }
 0x832   : > { %v3704_v9 = vpop.eup %2591  ;;  %v2032_v37 = vmul.f32 %v3652_v28, %v2016_v62  ;;  %v1954_v43 = vadd.f32 -1.4531521, %v1938_v7  ;;  %v2158_v31 = vsub.f32 1.0, %v2142_v6  ;;  %v2127_v52 = vmul.f32 1.442695, %v2098_v8 }
 0x833   : > { %v2143_v24 = vmul.f32 %v2590_v57, %v2063_v29  ;;  %v2001_v26 = vmul.f32 %v3670_v12, %v1985_v46  ;;  %v1939_v51 = vmul.f32 1.0614054, %v3704_v9  ;;  %v2084_v19 = vsub.f32 0.0, %v3667_v61 }
 0x834   : > { %v2048_v2 = vadd.f32 0.2548296, %v2032_v37  ;;  %v1970_v23 = vmul.f32 %v3693_v16, %v1954_v43  ;;  %v1840_v11 = vsel %vm1824_vm12, 1.0, %v2690_v60  ;;  %v2129_v15 = vmul.f32 1.442695, %v2099_v50 }
 0x835   : > { %v2159_v53 = vsub.f32 1.0, %v2143_v24  ;;  %v2017_v35 = vadd.f32 -0.28449672, %v2001_v26  ;;  %v1955_v20 = vadd.f32 -1.4531521, %v1939_v51  ;;  %v2189_v39 = vadd.f32 1.0, %v2173_v54 }
 0x836   : > { %v2064_v13 = vmul.f32 %v3652_v28, %v2048_v2  ;;  %v1986_v48 = vadd.f32 1.4214138, %v1970_v23  ;;  %v2594_v58 = vpop.eup %2593  ;;  %v2174_v47 = vmul.f32 %v2158_v31, %v3675_v27  ;;  %2599 = vpow2.f32 %v2127_v52 }
 0x837   : > { %v2175_v14 = vmul.f32 %v2159_v53, %v1839_v1  ;;  %v2033_v21 = vmul.f32 %v3670_v12, %v2017_v35  ;;  %v1971_v40 = vmul.f32 %v3704_v9, %v1955_v20  ;;  %v2100_v28 = vmul.f32 %v2084_v19, %v3667_v61 }
 0x838   : > { %v2144_v45 = vmul.f32 %v2594_v58, %v2064_v13  ;;  %v2002_v5 = vmul.f32 %v3693_v16, %v1986_v48  ;;  %v2596_v22 = vpop.eup %2595  ;;  %2601 = vpow2.f32 %v2129_v15  ;;  %v2205_v4 = vmul.f32 %v2189_v39, %v3591_v30 }
 0x839   : > { %v2191_v56 = vadd.f32 1.0, %v2175_v14  ;;  %v2049_v55 = vadd.f32 0.2548296, %v2033_v21  ;;  %v1987_v3 = vadd.f32 1.4214138, %v1971_v40  ;;  %v2190_v62 = vadd.f32 1.0, %v2174_v47 }
 0x83a   : > { %v2160_v59 = vsub.f32 1.0, %v2144_v45  ;;  %v2018_v63 = vadd.f32 -0.28449672, %v2002_v5  ;;  %v1940_v44 = vmul.f32 1.0614054, %v2596_v22  ;;  %v2598_v6 = vpop.eup %2597  ;;  %v1792_v37 = vmul.f32 0.5, %v3562_v49 }
 0x83b   : > { %v2207_v18 = vmul.f32 %v2191_v56, %v3683_v33  ;;  %v2065_v27 = vmul.f32 %v3670_v12, %v2049_v55  ;;  %v2003_v38 = vmul.f32 %v3704_v9, %v1987_v3  ;;  %v2131_v46 = vmul.f32 1.442695, %v2100_v28 }
 0x83c   : > { %v2176_v7 = vmul.f32 %v2160_v59, %v1840_v11  ;;  %v2034_v8 = vmul.f32 %v3693_v16, %v2018_v63  ;;  %v1956_v57 = vadd.f32 -1.4531521, %v1940_v44  ;;  %v2206_v12 = vmul.f32 %v2190_v62, %v3625_v32 }
 0x83d   : > { %v2219_v1 = vpack.c.bf16 %v2207_v18, %v2205_v4  ;;  %v2145_v61 = vmul.f32 %v2598_v6, %v2065_v27  ;;  %v2019_v29 = vadd.f32 -0.28449672, %v2003_v38  ;;  %vm1825_vm13 = vcmp.ge.f32.partialorder %v3596_v42, 0.0  ;;  %v2233_v27 = vpop.permute.xlu1 %2232 }
 0x83e   : > { %v2192_v43 = vadd.f32 1.0, %v2176_v7  ;;  %v2050_v30 = vadd.f32 0.2548296, %v2034_v8  ;;  %v1972_v50 = vmul.f32 %v2596_v22, %v1956_v57  ;;  %2603 = vpow2.f32 %v2131_v46 }
 0x83f   : > { %v2035_v33 = vmul.f32 %v3704_v9, %v2019_v29  ;;  %v2161_v51 = vsub.f32 1.0, %v2145_v61  ;;  %v1841_v35 = vsel %vm1825_vm13, 1.0, %v2690_v60  ;;  %vm1827_vm14 = vcmp.ge.f32.partialorder %v3632_v34, 0.0 }
 0x840   : > { %v2208_v54 = vmul.f32 %v2192_v43, %v1792_v37  ;;  %v2066_v24 = vmul.f32 %v3693_v16, %v2050_v30  ;;  %v1988_v26 = vadd.f32 1.4214138, %v1972_v50  ;;  %v2600_v2 = vpop.eup %2599  ;;  %vm1826_vm15 = vcmp.ge.f32.partialorder %v3628_v41, 0.0  ;;  %v2605_v37 = vld [vmem:[%s2873_s29] sm:$0xff]  ;;  %v2606_v50 = vld [vmem:[%s2873_s29 + $0x8] sm:$0xff] }
 0x841   : > { %v2051_v31 = vadd.f32 0.2548296, %v2035_v33  ;;  %v2177_v32 = vmul.f32 %v2161_v51, %v1841_v35  ;;  %v1843_v48 = vsel %vm1827_vm14, 1.0, %v2690_v60  ;;  %v1793_v21 = vmul.f32 0.5, %v3576_v36  ;;  %v2297_v61 = vpop.permute.xlu1 %2296 }
 0x842   : > { %v2004_v23 = vmul.f32 %v2596_v22, %v1988_v26  ;;  %v2220_v52 = vpack.c.bf16 %v2208_v54, %v2206_v12  ;;  %v2602_v53 = vpop.eup %2601  ;;  %v2146_v20 = vmul.f32 %v2600_v2, %v2066_v24  ;;  %v1842_v40 = vsel %vm1826_vm15, 1.0, %v2690_v60  ;;  %v2607_v54 = vld [vmem:[%s2873_s29 + $0x10] sm:$0xff]  ;;  %v2608_v26 = vld [vmem:[%s2873_s29 + $0x18] sm:$0xff]  ;;  %s2615_s29 = scalar_lea.vmem %s2614_s8, 1024 }
 0x843   : > { %v2067_v49 = vmul.f32 %v3704_v9, %v2051_v31  ;;  %v2193_v9 = vadd.f32 1.0, %v2177_v32  ;;  %v1795_v34 = vmul.f32 0.5, %v3616_v0  ;;  %vm1828_vm0 = vcmp.ge.f32.partialorder %v3662_v10, 0.0  ;;  %v2508_v10 = vld [vmem:[%s3824_s18] sm:$0xff]   ;;  %p2617_p1 = scmp.lt.s32.totalorder %s2615_s29, %s2609_s2 }
 0x844   : > { %v2020_v19 = vadd.f32 -0.28449672, %v2004_v23  ;;  %2248 = vmatprep.subr.bf16.mxu1 %v2220_v52  ;;  %v2162_v13 = vsub.f32 1.0, %v2146_v20  ;;  %v1844_v28 = vsel %vm1828_vm0, 1.0, %v2690_v60  ;;  %v1794_v36 = vmul.f32 0.5, %v3609_v17  ;;  %v2228_v60 = vpop.permute.xlu0 %2227 }
 0x845   : > { %v2147_v16 = vmul.f32 %v2602_v53, %v2067_v49  ;;  %2249 = vmatpush1.bf16.msra.mxu1 %v2219_v1  ;;  %v2209_v41 = vmul.f32 %v2193_v9, %v1793_v21  ;;  %v1796_v63 = vmul.f32 0.5, %v3649_v25  ;;  %p2618_p2 = por %p2617_p1, %p2616_p0 }
 0x846   : > { %v2036_v42 = vmul.f32 %v2596_v22, %v2020_v19  ;;  %v2178_v45 = vmul.f32 %v2162_v13, %v1842_v40 }
 0x847   : > { %v2163_v11 = vsub.f32 1.0, %v2147_v16  ;;  %p2619_p3 = pnand %p2618_p2, %p2612_p13 }
 0x848   : > { %v2052_v15 = vadd.f32 0.2548296, %v2036_v42  ;;  %v2604_v14 = vpop.eup %2603  ;;  %v2292_v6 = vpop.permute.xlu0 %2291 }
 0x849   : > { %v2179_v58 = vmul.f32 %v2163_v11, %v1843_v48 }
 0x84a   : > { %v2068_v39 = vmul.f32 %v2596_v22, %v2052_v15  ;;  %v2194_v22 = vadd.f32 1.0, %v2178_v45 }
 0x84b   : > { %v2195_v47 = vadd.f32 1.0, %v2179_v58 }
 0x84c   : > { %v2148_v5 = vmul.f32 %v2604_v14, %v2068_v39  ;;  %v2210_v44 = vmul.f32 %v2194_v22, %v1794_v36 }
 0x84d   : > { %v2211_v56 = vmul.f32 %v2195_v47, %v1795_v34 }
 0x84e   : > { %v2164_v55 = vsub.f32 1.0, %v2148_v5 }
 0x84f   : > { %v2221_v3 = vpack.c.bf16 %v2211_v56, %v2209_v41 }
 0x850   : > { %v2180_v59 = vmul.f32 %v2164_v55, %v1844_v28 }
 0x852   : > { %v2196_v0 = vadd.f32 1.0, %v2180_v59 }
 0x854   : > { %v2212_v4 = vmul.f32 %v2196_v0, %v1796_v63 }
 0x856   : > { %v2222_v18 = vpack.c.bf16 %v2212_v4, %v2210_v44 }
 0x858   : > { %2250 = vmatprep.subr.bf16.mxu1 %v2222_v18 }
 0x859   : > { %2251 = vmatpush1.bf16.msra.mxu1 %v2221_v3 }
 0x85c   : > { %2414 = vmatmul.mubr.msk.bf16.vlgmr.msra.gmra.mrb[16].mxu1 %vm2240_vm1, %v2508_v10 }
 0x92f   : > { %v2278_v17 = vpop.f32.mrb[16].mxu1 }
 0x930   : > { %v2279_v25 = vadd.f32 %v2278_v17, %v2228_v60  ;;  %v2280_v38 = vpop.f32.mrb[17].mxu1 }
 0x931   : > { %v2281_v62 = vadd.f32 %v2280_v38, %v2228_v60  ;;  %v2282_v7 = vpop.f32.mrb[18].mxu1 }
 0x932   : > { %v2299_v8 = vmul.f32 %v2292_v6, %v2279_v25  ;;  %v2283_v57 = vadd.f32 %v2282_v7, %v2233_v27  ;;  %v2284_v1 = vpop.f32.mrb[19].mxu1 }
 0x933   : > { %v2300_v29 = vmul.f32 %v2292_v6, %v2281_v62  ;;  %v2285_v46 = vadd.f32 %v2284_v1, %v2233_v27 }
 0x934   : > { %v2303_v43 = vadd.f32 %v2605_v37, %v2299_v8  ;;  %v2301_v30 = vmul.f32 %v2297_v61, %v2283_v57 }
 0x935   : > { %v2304_v33 = vadd.f32 %v2606_v50, %v2300_v29  ;;  %v2302_v12 = vmul.f32 %v2297_v61, %v2285_v46 }
 0x936   : > { %2307 = vst [vmem:[%s649_s6] sm:$0xff] %v2303_v43  ;;  %v2305_v24 = vadd.f32 %v2607_v54, %v2301_v30 }
 0x937   : > { %2308 = vst [vmem:[%s649_s6 + $0x8] sm:$0xff] %v2304_v33  ;;  %v2306_v51 = vadd.f32 %v2608_v26, %v2302_v12 }
 0x938   : > { %2309 = vst [vmem:[%s649_s6 + $0x10] sm:$0xff] %v2305_v24 }
 0x939   : > { %2310 = vst [vmem:[%s649_s6 + $0x18] sm:$0xff] %v2306_v51 }
 0x93a   : > { %2622 = shalt.err (!%p2619_p3)
}
 0x93b   : > { %s2623_s27 = scalar_lea.hbm %s3760_s21, 512  ;;  %s2627_s7 = scalar_lea.hbm %s3873_s4, 1024 }
 0x93c   : > { %p2624_p4 = scmp.ne.s32.totalorder %s3760_s21, %s2623_s27  ;;  %p2628_p9 = scmp.lt.u32.totalorder %s3760_s21, %s3873_s4 }
 0x93d   : > { %p2629_p10 = scmp.lt.u32.totalorder %s2627_s7, %s2623_s27  ;;  %p2631_p12 = scmp.lt.u32.totalorder %s2623_s27, %s3760_s21 }
 0x93e   : > { %p2625_p7 = pnand %p2624_p4, %p2841_p5 }
 0x93f   : > { %p2630_p11 = por %p2629_p10, %p2628_p9 }
 0x940   : > { %p2626_p8 = pneg %p2625_p7 }
 0x941   : > { %p2632_p13 = por %p2631_p12, %p2630_p11 }
 0x943   : > { %p2633_p0 = pnand %p2632_p13, %p2626_p8 }
 0x945   : > { %2636 = shalt.err (!%p2633_p0)
}
 0x946   : > { %s2692_s24 = smov 256   ;;  %s3874_s26 = smov 16  }
 0x947   : > { %2424 = dma.vmem_to_hbm [thread:$0]  (%p2841_p5), %s3753_s1, 512, %s3760_s21, %s3764_s3, %s2692_s24, %s2692_s24, %s3874_s26  }
 0x948 PF: > { %s3875_s2 = sld [smem:[#allocation7_spill]]  ;;  %s3876_s29 = sld [smem:[#allocation5_spill]] }
 0x94e   : > { %p2430_p1 = scmp.ge.s32.totalorder %s3875_s2, 2  ;;  %s2340_s0 = sand.u32 1, %s3876_s29  }
 0x94f   : > { %s2341_s27 = scalar_lea.sflag [#allocation3], %s2340_s0 }
 0x950   : > { %p2427_p2 = pnand %p2430_p1, %p2845_p6 }
 0x952   : > { %2654 = dma.done.wait (!%p2427_p2), %s2341_s27, 512  }
 0x953   : > { %2656 = vsyncadd (!%p2427_p2), %s2341_s27, 4294966784  ;;  %s3878_s27 = sld [smem:[#allocation8_spill]]  ;;  %s3879_s7 = sld [smem:[#allocation6_spill]] }
 0x954   : > { %s3880_s26 = sld [smem:[#allocation9_spill]]  ;;  %s3881_s2 = smov %s2663_s25 }
 0x959   : > { %p31_p3 = scmp.ge.s32.totalorder %s3878_s27, 4   ;;  %s3882_s25 = smov %s3879_s7 }
 0x95b   :  { %33 = sbr.rel (!%p31_p3) target bundleno = 14 (0xe), region = 139 }
 0x962   :  { %2346 = vsyncpa [#allocation3], 1 }
 0x963   :  { %2348 = vsyncpa [#allocation3 + $0x1], 1 }

</bundles_post_ra>
